<compile_context>
chip_gen: v7x
topology: tpu7x:2x2x1
jax: 0.10.0
libtpu: 0.0.40
codegen_flags: <defaults>
</compile_context>

<pallas_src>
import functools

import jax
import jax.numpy as jnp
from jax.experimental import pallas as pl
from jax.experimental.pallas import tpu as pltpu

LANE = 128


def _round_up(x, m):
    return ((x + m - 1) // m) * m


# ----------------------------------------------------------------------------
# Fused kernel
# ----------------------------------------------------------------------------
def _conv_bn_prelu(halo_ref, h, w_ref, s_ref, t_ref, a_ref, dilation, ksize, L):
    """Dilated conv (one matmul) + folded-BN affine + PReLU.

    h       : (L, CW) activations (time on sublanes, channels on lanes, CW=128-padded)
    w_ref   : (CW, ksize*CW) packed weight; tap k lives in columns [k*CW, k*CW+Cout)
    s/t_ref : (1, CW) BatchNorm scale / shift (conv bias pre-folded into shift)
    a_ref   : (1, 1) PReLU alpha
    """
    cw = h.shape[-1]
    pad = (ksize - 1) * dilation // 2
    lp = L + 2 * pad

    # In-kernel time halo: zero the scratch, drop h into its interior rows.
    halo_ref[...] = jnp.zeros(halo_ref.shape, jnp.float32)
    halo_ref[pad:pad + L, :] = h
    hp = halo_ref[0:lp, :]                                        # (L+2p, CW)

    # Single MXU matmul for all taps (output-side im2col).
    u = jnp.dot(hp, w_ref[...], preferred_element_type=jnp.float32)  # (L+2p, K*CW)

    # Gather the K taps with lane-aligned slices and sum (K-1 VALU adds).
    y = u[0:L, 0:cw]
    for k in range(1, ksize):
        y = y + u[k * dilation:k * dilation + L, k * cw:(k + 1) * cw]

    y = y * s_ref[...] + t_ref[...]                   # BN (bias folded into t)
    return jnp.where(y >= 0.0, y, a_ref[...] * y)     # PReLU


def tcn_fused_kernel(ksize, dilations, adapt_flags, x_ref, *refs):
    """Whole TCN forward for one batch item (grid step)."""
    halo_ref = refs[-1]                 # VMEM scratch for the conv halo
    out_ref = refs[-2]                  # (1, 1, OPAD) lane-dense logits slab
    prefs = refs[:-2]                   # packed weights / BN / PReLU params

    L = x_ref.shape[1]
    h = x_ref[0]                        # (L, CW) — one batch item, CW-padded lanes

    p = 0
    for d, use_adapt in zip(dilations, adapt_flags):
        w1, s1, t1, a1, w2, s2, t2, a2 = prefs[p:p + 8]
        p += 8
        if use_adapt:
            wr, br = prefs[p:p + 2]
            p += 2

        h1 = _conv_bn_prelu(halo_ref, h, w1, s1, t1, a1, d, ksize, L)
        y2 = _conv_bn_prelu(halo_ref, h1, w2, s2, t2, a2, d, ksize, L)

        if use_adapt:                   # 1x1 conv residual adapter
            res = jnp.dot(h, wr[...], preferred_element_type=jnp.float32) + br[...]
        else:
            res = h
        h = y2 + res                    # (L, CW)

    wfc, bfc = prefs[p:p + 2]
    fv = jnp.max(h, axis=0, keepdims=True)                           # global max pool -> (1, CW)
    logits = jnp.dot(fv, wfc[...], preferred_element_type=jnp.float32) + bfc[...]
    out_ref[...] = logits.reshape(out_ref.shape)                     # lane-dense store


# ----------------------------------------------------------------------------
# Parameter packing (plain JAX, outside the kernel): fold bias into BN shift,
# pad channels to the internal lane width CW, pack conv taps side-by-side.
# ----------------------------------------------------------------------------
def prepare_kernel_params(params, ksize, num_inputs):
    hidden, ocls = params["wfc"].shape
    cw = max(_round_up(num_inputs, LANE), _round_up(hidden, LANE))
    opad = _round_up(ocls, LANE)

    def pack_conv(w_kio):                       # (K, cin, cout) -> (CW, K*CW)
        K, cin, cout = w_kio.shape
        w = jnp.zeros((cw, K * cw), jnp.float32)
        for k in range(K):
            w = w.at[:cin, k * cw:k * cw + cout].set(w_kio[k])
        return w

    def pack_bn(s, t, b):                       # fold conv bias: t' = t + b*s
        cout = s.shape[-1]
        sp = jnp.ones((1, cw), jnp.float32).at[:, :cout].set(s)
        tp = jnp.zeros((1, cw), jnp.float32).at[:, :cout].set(t + b * s)
        return sp, tp

    flat, dilations, adapt_flags = [], [], []
    for i, bp in enumerate(params["blocks"]):
        dilations.append(2 ** i)
        w1c = pack_conv(bp["w1"])
        s1p, t1p = pack_bn(bp["s1"], bp["t1"], bp["b1"])
        w2c = pack_conv(bp["w2"])
        s2p, t2p = pack_bn(bp["s2"], bp["t2"], bp["b2"])
        flat += [w1c, s1p, t1p, bp["a1"], w2c, s2p, t2p, bp["a2"]]
        if "wr" in bp:                          # adapt_features (1x1 conv)
            cin, cout = bp["wr"].shape
            wrp = jnp.zeros((cw, cw), jnp.float32).at[:cin, :cout].set(bp["wr"])
            brp = jnp.zeros((1, cw), jnp.float32).at[:, :cout].set(bp["br"])
            flat += [wrp, brp]
            adapt_flags.append(True)
        else:
            adapt_flags.append(False)

    wfcp = jnp.zeros((cw, opad), jnp.float32).at[:hidden, :ocls].set(params["wfc"])
    bfcp = jnp.zeros((1, opad), jnp.float32).at[:, :ocls].set(params["bfc"])
    flat += [wfcp, bfcp]
    return flat, tuple(dilations), tuple(adapt_flags), cw, opad


# ----------------------------------------------------------------------------
# Wrapper
# ----------------------------------------------------------------------------
def tcn_forward(x_blc, params, kernel_size, pool=False):
    """x_blc: (B, L, C_in) activations; returns (B, out_classes) logits."""
    assert not pool  # TODO(synk): pool=True path (F.max_pool1d(a, 2) per block) not implemented; module default is pool=False.
    B, L, cin = x_blc.shape
    nb = len(params["blocks"])
    for i in range(nb):
        assert (kernel_size - 1) * (2 ** i) % 2 == 0, (
            "residual add requires 'same'-length convs ((k-1)*dilation even)")

    flat, dilations, adapt_flags, cw, opad = prepare_kernel_params(
        params, kernel_size, cin)
    out_classes = params["wfc"].shape[1]

    # One-time lane pad of the network input to the internal channel width
    # (glue only; all per-layer halos / intermediates stay inside the kernel).
    x_pad = jnp.pad(x_blc, ((0, 0), (0, 0), (0, cw - cin)))

    pad_max = (kernel_size - 1) * (2 ** (nb - 1)) // 2
    lp_max = L + 2 * pad_max

    in_specs = [pl.BlockSpec((1, L, cw), lambda b: (b, 0, 0))]
    in_specs += [pl.BlockSpec(a.shape, lambda b: (0, 0)) for a in flat]

    kernel = functools.partial(tcn_fused_kernel, kernel_size, dilations, adapt_flags)
    out = pl.pallas_call(
        kernel,
        grid=(B,),                                   # one batch item per grid step
        out_shape=jax.ShapeDtypeStruct((B, 1, opad), jnp.float32),
        in_specs=in_specs,
        out_specs=pl.BlockSpec((1, 1, opad), lambda b: (b, 0, 0)),
        scratch_shapes=[pltpu.VMEM((lp_max, cw), jnp.float32)],
        compiler_params=pltpu.CompilerParams(
            dimension_semantics=("parallel",)),      # v7x: 2 TCs split the batch
    )(x_pad, *flat)
    return out[:, 0, :out_classes]


# ----------------------------------------------------------------------------
# Deterministic parameter initialization (synthetic weights, PyTorch-like layout)
# ----------------------------------------------------------------------------
def init_params(key, out_classes, num_blocks, hidden, num_inputs, ksize):
    eps = 1e-5

    def bn_params(kg, kb, km, kv, c):
        gamma = jax.random.uniform(kg, (c,), minval=0.5, maxval=1.5)
        beta = 0.1 * jax.random.normal(kb, (c,))
        mean = 0.1 * jax.random.normal(km, (c,))
        var = jax.random.uniform(kv, (c,), minval=0.5, maxval=1.5)
        s = gamma / jnp.sqrt(var + eps)
        t = beta - mean * s
        return (s.reshape(1, c).astype(jnp.float32),
                t.reshape(1, c).astype(jnp.float32))

    params = {"blocks": []}
    bkeys = jax.random.split(key, num_blocks + 1)
    for i in range(num_blocks):
        cin = num_inputs if i == 0 else hidden
        cout = hidden
        ks = jax.random.split(bkeys[i], 16)
        bp = {}
        bp["w1"] = (jax.random.normal(ks[0], (ksize, cin, cout)) /
                    jnp.sqrt(cin * ksize)).astype(jnp.float32)
        bp["b1"] = (0.1 * jax.random.normal(ks[1], (1, cout))).astype(jnp.float32)
        bp["s1"], bp["t1"] = bn_params(ks[2], ks[3], ks[4], ks[5], cout)
        bp["a1"] = jnp.full((1, 1), 0.25, jnp.float32)   # PReLU default init
        bp["w2"] = (jax.random.normal(ks[6], (ksize, cout, cout)) /
                    jnp.sqrt(cout * ksize)).astype(jnp.float32)
        bp["b2"] = (0.1 * jax.random.normal(ks[7], (1, cout))).astype(jnp.float32)
        bp["s2"], bp["t2"] = bn_params(ks[8], ks[9], ks[10], ks[11], cout)
        bp["a2"] = jnp.full((1, 1), 0.25, jnp.float32)
        if cin != cout:  # adapt_features: 1x1 conv
            bp["wr"] = (jax.random.normal(ks[12], (cin, cout)) /
                        jnp.sqrt(cin)).astype(jnp.float32)
            bp["br"] = (0.1 * jax.random.normal(ks[13], (1, cout))).astype(jnp.float32)
        params["blocks"].append(bp)

    fk = jax.random.split(bkeys[-1], 2)
    params["wfc"] = (jax.random.normal(fk[0], (hidden, out_classes)) /
                     jnp.sqrt(hidden)).astype(jnp.float32)
    params["bfc"] = (0.1 * jax.random.normal(fk[1], (1, out_classes))).astype(jnp.float32)
    return params


# ----------------------------------------------------------------------------
# Pure-JAX reference (mirrors PyTorch NCL semantics) for validation
# ----------------------------------------------------------------------------
def reference_forward(x_ncl, params, ksize):
    h = x_ncl  # (B, C, L)
    for i, bp in enumerate(params["blocks"]):
        d = 2 ** i
        pad = (ksize - 1) * d // 2

        def conv(inp, w_kio, b):
            w_oik = jnp.transpose(w_kio, (2, 1, 0))      # (Cout, Cin, K)
            y = jax.lax.conv_general_dilated(
                inp, w_oik, window_strides=(1,), padding=[(pad, pad)],
                rhs_dilation=(d,), dimension_numbers=("NCH", "OIH", "NCH"))
            return y + b.reshape(1, -1, 1)

        def bn(y, s, t):
            return y * s.reshape(1, -1, 1) + t.reshape(1, -1, 1)

        def prelu(y, a):
            return jnp.where(y >= 0, y, a[0, 0] * y)

        o = prelu(bn(conv(h, bp["w1"], bp["b1"]), bp["s1"], bp["t1"]), bp["a1"])
        o = prelu(bn(conv(o, bp["w2"], bp["b2"]), bp["s2"], bp["t2"]), bp["a2"])
        if "wr" in bp:
            res = jnp.einsum("bcl,co->bol", h, bp["wr"]) + bp["br"].reshape(1, -1, 1)
        else:
            res = h
        h = o + res
    fv = jnp.max(h, axis=-1)                             # global max pool
    return fv @ params["wfc"] + params["bfc"]


# ----------------------------------------------------------------------------
if __name__ == "__main__":
    # TCN(out_classes=5, num_blocks=2, num_hidden_units=32, num_inputs=16,
    #     kernel_size=3, dropout=0.2, pool=False)  — eval mode.
    B, L = 2, 16
    num_inputs, hidden, num_blocks, ksize, out_classes = 16, 32, 2, 3, 5

    key = jax.random.PRNGKey(0)
    kp, kx = jax.random.split(key)
    params = init_params(kp, out_classes, num_blocks, hidden, num_inputs, ksize)

    x_ncl = jax.random.normal(kx, (B, num_inputs, L), jnp.float32)  # PyTorch (B, C, L)
    x_blc = jnp.transpose(x_ncl, (0, 2, 1))                         # kernel layout (B, L, C)

    logits = tcn_forward(x_blc, params, ksize, pool=False)
    logits = jax.block_until_ready(logits)

    ref = reference_forward(x_ncl, params, ksize)
    assert logits.shape == (B, out_classes)
    assert bool(jnp.allclose(logits, ref, atol=1e-4, rtol=1e-4)), (
        "Pallas TCN output mismatch vs JAX reference")
    print("KERNEL_OK")
</pallas_src>

<mosaic_0001>
module attributes {stable_mosaic.version = 11 : i64} {
  func.func @tcn_fused_kernel(%arg0: i32, %arg1: memref<1x16x128xf32, #tpu.memory_space<vmem>>, %arg2: memref<128x384xf32, #tpu.memory_space<vmem>>, %arg3: memref<1x128xf32, #tpu.memory_space<vmem>>, %arg4: memref<1x128xf32, #tpu.memory_space<vmem>>, %arg5: memref<1x1xf32, #tpu.memory_space<vmem>>, %arg6: memref<128x384xf32, #tpu.memory_space<vmem>>, %arg7: memref<1x128xf32, #tpu.memory_space<vmem>>, %arg8: memref<1x128xf32, #tpu.memory_space<vmem>>, %arg9: memref<1x1xf32, #tpu.memory_space<vmem>>, %arg10: memref<128x128xf32, #tpu.memory_space<vmem>>, %arg11: memref<1x128xf32, #tpu.memory_space<vmem>>, %arg12: memref<128x384xf32, #tpu.memory_space<vmem>>, %arg13: memref<1x128xf32, #tpu.memory_space<vmem>>, %arg14: memref<1x128xf32, #tpu.memory_space<vmem>>, %arg15: memref<1x1xf32, #tpu.memory_space<vmem>>, %arg16: memref<128x384xf32, #tpu.memory_space<vmem>>, %arg17: memref<1x128xf32, #tpu.memory_space<vmem>>, %arg18: memref<1x128xf32, #tpu.memory_space<vmem>>, %arg19: memref<1x1xf32, #tpu.memory_space<vmem>>, %arg20: memref<128x128xf32, #tpu.memory_space<vmem>>, %arg21: memref<1x128xf32, #tpu.memory_space<vmem>>, %arg22: memref<1x1x128xf32, #tpu.memory_space<vmem>>, %arg23: memref<20x128xf32, #tpu.memory_space<vmem>>) attributes {dimension_semantics = [#tpu.dimension_semantics<parallel>], iteration_bounds = array<i64: 2>, scalar_prefetch = 0 : i64, scratch_operands = 1 : i64, tpu.core_type = #tpu.core_type<tc>, window_params = [{transform_indices = @transform_0, window_bounds = array<i64: 1, 16, 128>}, {pipeline_mode = #tpu.pipeline_mode<synchronous>, transform_indices = @transform_1, window_bounds = array<i64: 128, 384>}, {pipeline_mode = #tpu.pipeline_mode<synchronous>, transform_indices = @transform_2, window_bounds = array<i64: 1, 128>}, {pipeline_mode = #tpu.pipeline_mode<synchronous>, transform_indices = @transform_3, window_bounds = array<i64: 1, 128>}, {pipeline_mode = #tpu.pipeline_mode<synchronous>, transform_indices = @transform_4, window_bounds = array<i64: 1, 1>}, {pipeline_mode = #tpu.pipeline_mode<synchronous>, transform_indices = @transform_5, window_bounds = array<i64: 128, 384>}, {pipeline_mode = #tpu.pipeline_mode<synchronous>, transform_indices = @transform_6, window_bounds = array<i64: 1, 128>}, {pipeline_mode = #tpu.pipeline_mode<synchronous>, transform_indices = @transform_7, window_bounds = array<i64: 1, 128>}, {pipeline_mode = #tpu.pipeline_mode<synchronous>, transform_indices = @transform_8, window_bounds = array<i64: 1, 1>}, {pipeline_mode = #tpu.pipeline_mode<synchronous>, transform_indices = @transform_9, window_bounds = array<i64: 128, 128>}, {pipeline_mode = #tpu.pipeline_mode<synchronous>, transform_indices = @transform_10, window_bounds = array<i64: 1, 128>}, {pipeline_mode = #tpu.pipeline_mode<synchronous>, transform_indices = @transform_11, window_bounds = array<i64: 128, 384>}, {pipeline_mode = #tpu.pipeline_mode<synchronous>, transform_indices = @transform_12, window_bounds = array<i64: 1, 128>}, {pipeline_mode = #tpu.pipeline_mode<synchronous>, transform_indices = @transform_13, window_bounds = array<i64: 1, 128>}, {pipeline_mode = #tpu.pipeline_mode<synchronous>, transform_indices = @transform_14, window_bounds = array<i64: 1, 1>}, {pipeline_mode = #tpu.pipeline_mode<synchronous>, transform_indices = @transform_15, window_bounds = array<i64: 128, 384>}, {pipeline_mode = #tpu.pipeline_mode<synchronous>, transform_indices = @transform_16, window_bounds = array<i64: 1, 128>}, {pipeline_mode = #tpu.pipeline_mode<synchronous>, transform_indices = @transform_17, window_bounds = array<i64: 1, 128>}, {pipeline_mode = #tpu.pipeline_mode<synchronous>, transform_indices = @transform_18, window_bounds = array<i64: 1, 1>}, {pipeline_mode = #tpu.pipeline_mode<synchronous>, transform_indices = @transform_19, window_bounds = array<i64: 128, 128>}, {pipeline_mode = #tpu.pipeline_mode<synchronous>, transform_indices = @transform_20, window_bounds = array<i64: 1, 128>}, {transform_indices = @transform_21, window_bounds = array<i64: 1, 1, 128>}]} {
    %c0 = arith.constant 0 : index
    %c0_0 = arith.constant 0 : index
    %c0_1 = arith.constant 0 : index
    %0 = vector.load %arg1[%c0, %c0_0, %c0_1] : memref<1x16x128xf32, #tpu.memory_space<vmem>>, vector<1x16x128xf32>
    %1 = vector.shape_cast %0 : vector<1x16x128xf32> to vector<16x128xf32>
    %cst = arith.constant 0.000000e+00 : f32
    %2 = vector.broadcast %cst : f32 to vector<20x128xf32>
    %c0_2 = arith.constant 0 : index
    %c0_3 = arith.constant 0 : index
    %3 = vector.load %arg23[%c0_2, %c0_3] : memref<20x128xf32, #tpu.memory_space<vmem>>, vector<20x128xf32>
    tpu.vector_store %arg23[%c0_2, %c0_3], %2 {strides = array<i32>} : memref<20x128xf32, #tpu.memory_space<vmem>>, vector<20x128xf32>,
    %c1 = arith.constant 1 : index
    %c0_4 = arith.constant 0 : index
    %4 = vector.load %arg23[%c1, %c0_4] : memref<20x128xf32, #tpu.memory_space<vmem>>, vector<16x128xf32>
    tpu.vector_store %arg23[%c1, %c0_4], %1 {strides = array<i32>} : memref<20x128xf32, #tpu.memory_space<vmem>>, vector<16x128xf32>,
    %c0_5 = arith.constant 0 : index
    %c0_6 = arith.constant 0 : index
    %5 = vector.load %arg23[%c0_5, %c0_6] : memref<20x128xf32, #tpu.memory_space<vmem>>, vector<18x128xf32>
    %c0_7 = arith.constant 0 : index
    %c0_8 = arith.constant 0 : index
    %6 = vector.load %arg2[%c0_7, %c0_8] : memref<128x384xf32, #tpu.memory_space<vmem>>, vector<128x384xf32>
    %cst_9 = arith.constant dense<0.000000e+00> : vector<18x384xf32>
    %7 = tpu.matmul %5, %6, %cst_9 {dimension_numbers = #tpu.dot_dimension_numbers<[1], [0], [0], [1], [0, 0, 1, 1], [], []>} : vector<18x128xf32>, vector<128x384xf32>, vector<18x384xf32> -> vector<18x384xf32>
    %8 = vector.extract_strided_slice %7 {offsets = [0, 0], sizes = [16, 128], strides = [1, 1]} : vector<18x384xf32> to vector<16x128xf32>
    %9 = vector.extract_strided_slice %7 {offsets = [1, 128], sizes = [16, 128], strides = [1, 1]} : vector<18x384xf32> to vector<16x128xf32>
    %10 = arith.addf %8, %9 : vector<16x128xf32>
    %11 = vector.extract_strided_slice %7 {offsets = [2, 256], sizes = [16, 128], strides = [1, 1]} : vector<18x384xf32> to vector<16x128xf32>
    %12 = arith.addf %10, %11 : vector<16x128xf32>
    %c0_10 = arith.constant 0 : index
    %c0_11 = arith.constant 0 : index
    %13 = vector.load %arg3[%c0_10, %c0_11] : memref<1x128xf32, #tpu.memory_space<vmem>>, vector<1x128xf32>
    %14 = vector.broadcast %13 : vector<1x128xf32> to vector<16x128xf32>
    %15 = arith.mulf %12, %14 : vector<16x128xf32>
    %c0_12 = arith.constant 0 : index
    %c0_13 = arith.constant 0 : index
    %16 = vector.load %arg4[%c0_12, %c0_13] : memref<1x128xf32, #tpu.memory_space<vmem>>, vector<1x128xf32>
    %17 = vector.broadcast %16 : vector<1x128xf32> to vector<16x128xf32>
    %18 = arith.addf %15, %17 : vector<16x128xf32>
    %cst_14 = arith.constant 0.000000e+00 : f32
    %19 = vector.broadcast %cst_14 : f32 to vector<16x128xf32>
    %20 = arith.cmpf oge, %18, %19 : vector<16x128xf32>
    %c0_15 = arith.constant 0 : index
    %c0_16 = arith.constant 0 : index
    %21 = vector.load %arg5[%c0_15, %c0_16] : memref<1x1xf32, #tpu.memory_space<vmem>>, vector<1x1xf32>
    %22 = vector.broadcast %21 : vector<1x1xf32> to vector<16x128xf32>
    %23 = arith.mulf %22, %18 : vector<16x128xf32>
    %24 = arith.select %20, %18, %23 : vector<16x128xi1>, vector<16x128xf32>
    %cst_17 = arith.constant 0.000000e+00 : f32
    %25 = vector.broadcast %cst_17 : f32 to vector<20x128xf32>
    %c0_18 = arith.constant 0 : index
    %c0_19 = arith.constant 0 : index
    %26 = vector.load %arg23[%c0_18, %c0_19] : memref<20x128xf32, #tpu.memory_space<vmem>>, vector<20x128xf32>
    tpu.vector_store %arg23[%c0_18, %c0_19], %25 {strides = array<i32>} : memref<20x128xf32, #tpu.memory_space<vmem>>, vector<20x128xf32>,
    %c1_20 = arith.constant 1 : index
    %c0_21 = arith.constant 0 : index
    %27 = vector.load %arg23[%c1_20, %c0_21] : memref<20x128xf32, #tpu.memory_space<vmem>>, vector<16x128xf32>
    tpu.vector_store %arg23[%c1_20, %c0_21], %24 {strides = array<i32>} : memref<20x128xf32, #tpu.memory_space<vmem>>, vector<16x128xf32>,
    %c0_22 = arith.constant 0 : index
    %c0_23 = arith.constant 0 : index
    %28 = vector.load %arg23[%c0_22, %c0_23] : memref<20x128xf32, #tpu.memory_space<vmem>>, vector<18x128xf32>
    %c0_24 = arith.constant 0 : index
    %c0_25 = arith.constant 0 : index
    %29 = vector.load %arg6[%c0_24, %c0_25] : memref<128x384xf32, #tpu.memory_space<vmem>>, vector<128x384xf32>
    %cst_26 = arith.constant dense<0.000000e+00> : vector<18x384xf32>
    %30 = tpu.matmul %28, %29, %cst_26 {dimension_numbers = #tpu.dot_dimension_numbers<[1], [0], [0], [1], [0, 0, 1, 1], [], []>} : vector<18x128xf32>, vector<128x384xf32>, vector<18x384xf32> -> vector<18x384xf32>
    %31 = vector.extract_strided_slice %30 {offsets = [0, 0], sizes = [16, 128], strides = [1, 1]} : vector<18x384xf32> to vector<16x128xf32>
    %32 = vector.extract_strided_slice %30 {offsets = [1, 128], sizes = [16, 128], strides = [1, 1]} : vector<18x384xf32> to vector<16x128xf32>
    %33 = arith.addf %31, %32 : vector<16x128xf32>
    %34 = vector.extract_strided_slice %30 {offsets = [2, 256], sizes = [16, 128], strides = [1, 1]} : vector<18x384xf32> to vector<16x128xf32>
    %35 = arith.addf %33, %34 : vector<16x128xf32>
    %c0_27 = arith.constant 0 : index
    %c0_28 = arith.constant 0 : index
    %36 = vector.load %arg7[%c0_27, %c0_28] : memref<1x128xf32, #tpu.memory_space<vmem>>, vector<1x128xf32>
    %37 = vector.broadcast %36 : vector<1x128xf32> to vector<16x128xf32>
    %38 = arith.mulf %35, %37 : vector<16x128xf32>
    %c0_29 = arith.constant 0 : index
    %c0_30 = arith.constant 0 : index
    %39 = vector.load %arg8[%c0_29, %c0_30] : memref<1x128xf32, #tpu.memory_space<vmem>>, vector<1x128xf32>
    %40 = vector.broadcast %39 : vector<1x128xf32> to vector<16x128xf32>
    %41 = arith.addf %38, %40 : vector<16x128xf32>
    %cst_31 = arith.constant 0.000000e+00 : f32
    %42 = vector.broadcast %cst_31 : f32 to vector<16x128xf32>
    %43 = arith.cmpf oge, %41, %42 : vector<16x128xf32>
    %c0_32 = arith.constant 0 : index
    %c0_33 = arith.constant 0 : index
    %44 = vector.load %arg9[%c0_32, %c0_33] : memref<1x1xf32, #tpu.memory_space<vmem>>, vector<1x1xf32>
    %45 = vector.broadcast %44 : vector<1x1xf32> to vector<16x128xf32>
    %46 = arith.mulf %45, %41 : vector<16x128xf32>
    %47 = arith.select %43, %41, %46 : vector<16x128xi1>, vector<16x128xf32>
    %c0_34 = arith.constant 0 : index
    %c0_35 = arith.constant 0 : index
    %48 = vector.load %arg10[%c0_34, %c0_35] : memref<128x128xf32, #tpu.memory_space<vmem>>, vector<128x128xf32>
    %cst_36 = arith.constant dense<0.000000e+00> : vector<16x128xf32>
    %49 = tpu.matmul %1, %48, %cst_36 {dimension_numbers = #tpu.dot_dimension_numbers<[1], [0], [0], [1], [0, 0, 1, 1], [], []>} : vector<16x128xf32>, vector<128x128xf32>, vector<16x128xf32> -> vector<16x128xf32>
    %c0_37 = arith.constant 0 : index
    %c0_38 = arith.constant 0 : index
    %50 = vector.load %arg11[%c0_37, %c0_38] : memref<1x128xf32, #tpu.memory_space<vmem>>, vector<1x128xf32>
    %51 = vector.broadcast %50 : vector<1x128xf32> to vector<16x128xf32>
    %52 = arith.addf %49, %51 : vector<16x128xf32>
    %53 = arith.addf %47, %52 : vector<16x128xf32>
    %cst_39 = arith.constant 0.000000e+00 : f32
    %54 = vector.broadcast %cst_39 : f32 to vector<20x128xf32>
    %c0_40 = arith.constant 0 : index
    %c0_41 = arith.constant 0 : index
    %55 = vector.load %arg23[%c0_40, %c0_41] : memref<20x128xf32, #tpu.memory_space<vmem>>, vector<20x128xf32>
    tpu.vector_store %arg23[%c0_40, %c0_41], %54 {strides = array<i32>} : memref<20x128xf32, #tpu.memory_space<vmem>>, vector<20x128xf32>,
    %c2 = arith.constant 2 : index
    %c0_42 = arith.constant 0 : index
    %56 = vector.load %arg23[%c2, %c0_42] : memref<20x128xf32, #tpu.memory_space<vmem>>, vector<16x128xf32>
    tpu.vector_store %arg23[%c2, %c0_42], %53 {strides = array<i32>} : memref<20x128xf32, #tpu.memory_space<vmem>>, vector<16x128xf32>,
    %c0_43 = arith.constant 0 : index
    %c0_44 = arith.constant 0 : index
    %57 = vector.load %arg23[%c0_43, %c0_44] : memref<20x128xf32, #tpu.memory_space<vmem>>, vector<20x128xf32>
    %c0_45 = arith.constant 0 : index
    %c0_46 = arith.constant 0 : index
    %58 = vector.load %arg12[%c0_45, %c0_46] : memref<128x384xf32, #tpu.memory_space<vmem>>, vector<128x384xf32>
    %cst_47 = arith.constant dense<0.000000e+00> : vector<20x384xf32>
    %59 = tpu.matmul %57, %58, %cst_47 {dimension_numbers = #tpu.dot_dimension_numbers<[1], [0], [0], [1], [0, 0, 1, 1], [], []>} : vector<20x128xf32>, vector<128x384xf32>, vector<20x384xf32> -> vector<20x384xf32>
    %60 = vector.extract_strided_slice %59 {offsets = [0, 0], sizes = [16, 128], strides = [1, 1]} : vector<20x384xf32> to vector<16x128xf32>
    %61 = vector.extract_strided_slice %59 {offsets = [2, 128], sizes = [16, 128], strides = [1, 1]} : vector<20x384xf32> to vector<16x128xf32>
    %62 = arith.addf %60, %61 : vector<16x128xf32>
    %63 = vector.extract_strided_slice %59 {offsets = [4, 256], sizes = [16, 128], strides = [1, 1]} : vector<20x384xf32> to vector<16x128xf32>
    %64 = arith.addf %62, %63 : vector<16x128xf32>
    %c0_48 = arith.constant 0 : index
    %c0_49 = arith.constant 0 : index
    %65 = vector.load %arg13[%c0_48, %c0_49] : memref<1x128xf32, #tpu.memory_space<vmem>>, vector<1x128xf32>
    %66 = vector.broadcast %65 : vector<1x128xf32> to vector<16x128xf32>
    %67 = arith.mulf %64, %66 : vector<16x128xf32>
    %c0_50 = arith.constant 0 : index
    %c0_51 = arith.constant 0 : index
    %68 = vector.load %arg14[%c0_50, %c0_51] : memref<1x128xf32, #tpu.memory_space<vmem>>, vector<1x128xf32>
    %69 = vector.broadcast %68 : vector<1x128xf32> to vector<16x128xf32>
    %70 = arith.addf %67, %69 : vector<16x128xf32>
    %cst_52 = arith.constant 0.000000e+00 : f32
    %71 = vector.broadcast %cst_52 : f32 to vector<16x128xf32>
    %72 = arith.cmpf oge, %70, %71 : vector<16x128xf32>
    %c0_53 = arith.constant 0 : index
    %c0_54 = arith.constant 0 : index
    %73 = vector.load %arg15[%c0_53, %c0_54] : memref<1x1xf32, #tpu.memory_space<vmem>>, vector<1x1xf32>
    %74 = vector.broadcast %73 : vector<1x1xf32> to vector<16x128xf32>
    %75 = arith.mulf %74, %70 : vector<16x128xf32>
    %76 = arith.select %72, %70, %75 : vector<16x128xi1>, vector<16x128xf32>
    %cst_55 = arith.constant 0.000000e+00 : f32
    %77 = vector.broadcast %cst_55 : f32 to vector<20x128xf32>
    %c0_56 = arith.constant 0 : index
    %c0_57 = arith.constant 0 : index
    %78 = vector.load %arg23[%c0_56, %c0_57] : memref<20x128xf32, #tpu.memory_space<vmem>>, vector<20x128xf32>
    tpu.vector_store %arg23[%c0_56, %c0_57], %77 {strides = array<i32>} : memref<20x128xf32, #tpu.memory_space<vmem>>, vector<20x128xf32>,
    %c2_58 = arith.constant 2 : index
    %c0_59 = arith.constant 0 : index
    %79 = vector.load %arg23[%c2_58, %c0_59] : memref<20x128xf32, #tpu.memory_space<vmem>>, vector<16x128xf32>
    tpu.vector_store %arg23[%c2_58, %c0_59], %76 {strides = array<i32>} : memref<20x128xf32, #tpu.memory_space<vmem>>, vector<16x128xf32>,
    %c0_60 = arith.constant 0 : index
    %c0_61 = arith.constant 0 : index
    %80 = vector.load %arg23[%c0_60, %c0_61] : memref<20x128xf32, #tpu.memory_space<vmem>>, vector<20x128xf32>
    %c0_62 = arith.constant 0 : index
    %c0_63 = arith.constant 0 : index
    %81 = vector.load %arg16[%c0_62, %c0_63] : memref<128x384xf32, #tpu.memory_space<vmem>>, vector<128x384xf32>
    %cst_64 = arith.constant dense<0.000000e+00> : vector<20x384xf32>
    %82 = tpu.matmul %80, %81, %cst_64 {dimension_numbers = #tpu.dot_dimension_numbers<[1], [0], [0], [1], [0, 0, 1, 1], [], []>} : vector<20x128xf32>, vector<128x384xf32>, vector<20x384xf32> -> vector<20x384xf32>
    %83 = vector.extract_strided_slice %82 {offsets = [0, 0], sizes = [16, 128], strides = [1, 1]} : vector<20x384xf32> to vector<16x128xf32>
    %84 = vector.extract_strided_slice %82 {offsets = [2, 128], sizes = [16, 128], strides = [1, 1]} : vector<20x384xf32> to vector<16x128xf32>
    %85 = arith.addf %83, %84 : vector<16x128xf32>
    %86 = vector.extract_strided_slice %82 {offsets = [4, 256], sizes = [16, 128], strides = [1, 1]} : vector<20x384xf32> to vector<16x128xf32>
    %87 = arith.addf %85, %86 : vector<16x128xf32>
    %c0_65 = arith.constant 0 : index
    %c0_66 = arith.constant 0 : index
    %88 = vector.load %arg17[%c0_65, %c0_66] : memref<1x128xf32, #tpu.memory_space<vmem>>, vector<1x128xf32>
    %89 = vector.broadcast %88 : vector<1x128xf32> to vector<16x128xf32>
    %90 = arith.mulf %87, %89 : vector<16x128xf32>
    %c0_67 = arith.constant 0 : index
    %c0_68 = arith.constant 0 : index
    %91 = vector.load %arg18[%c0_67, %c0_68] : memref<1x128xf32, #tpu.memory_space<vmem>>, vector<1x128xf32>
    %92 = vector.broadcast %91 : vector<1x128xf32> to vector<16x128xf32>
    %93 = arith.addf %90, %92 : vector<16x128xf32>
    %cst_69 = arith.constant 0.000000e+00 : f32
    %94 = vector.broadcast %cst_69 : f32 to vector<16x128xf32>
    %95 = arith.cmpf oge, %93, %94 : vector<16x128xf32>
    %c0_70 = arith.constant 0 : index
    %c0_71 = arith.constant 0 : index
    %96 = vector.load %arg19[%c0_70, %c0_71] : memref<1x1xf32, #tpu.memory_space<vmem>>, vector<1x1xf32>
    %97 = vector.broadcast %96 : vector<1x1xf32> to vector<16x128xf32>
    %98 = arith.mulf %97, %93 : vector<16x128xf32>
    %99 = arith.select %95, %93, %98 : vector<16x128xi1>, vector<16x128xf32>
    %100 = arith.addf %99, %53 : vector<16x128xf32>
    %cst_72 = arith.constant dense<0xFF800000> : vector<128xf32>
    %101 = vector.multi_reduction <maximumf>, %100, %cst_72 [0] : vector<16x128xf32> to vector<128xf32>
    %102 = vector.shape_cast %101 : vector<128xf32> to vector<1x128xf32>
    %c0_73 = arith.constant 0 : index
    %c0_74 = arith.constant 0 : index
    %103 = vector.load %arg20[%c0_73, %c0_74] : memref<128x128xf32, #tpu.memory_space<vmem>>, vector<128x128xf32>
    %cst_75 = arith.constant dense<0.000000e+00> : vector<1x128xf32>
    %104 = tpu.matmul %102, %103, %cst_75 {dimension_numbers = #tpu.dot_dimension_numbers<[1], [0], [0], [1], [0, 0, 1, 1], [], []>} : vector<1x128xf32>, vector<128x128xf32>, vector<1x128xf32> -> vector<1x128xf32>
    %c0_76 = arith.constant 0 : index
    %c0_77 = arith.constant 0 : index
    %105 = vector.load %arg21[%c0_76, %c0_77] : memref<1x128xf32, #tpu.memory_space<vmem>>, vector<1x128xf32>
    %106 = arith.addf %104, %105 : vector<1x128xf32>
    %107 = vector.shape_cast %106 : vector<1x128xf32> to vector<1x1x128xf32>
    %c0_78 = arith.constant 0 : index
    %c0_79 = arith.constant 0 : index
    %c0_80 = arith.constant 0 : index
    %108 = vector.load %arg22[%c0_78, %c0_79, %c0_80] : memref<1x1x128xf32, #tpu.memory_space<vmem>>, vector<1x1x128xf32>
    tpu.vector_store %arg22[%c0_78, %c0_79, %c0_80], %107 {strides = array<i32>} : memref<1x1x128xf32, #tpu.memory_space<vmem>>, vector<1x1x128xf32>,
    return
  }
  func.func @transform_0(%arg0: i32) -> (i32, i32, i32) {
    %c0_i32 = arith.constant 0 : i32
    %c0_i32_0 = arith.constant 0 : i32
    %c0_i32_1 = arith.constant 0 : i32
    return %arg0, %c0_i32, %c0_i32_0 : i32, i32, i32
  }
  func.func @transform_1(%arg0: i32) -> (i32, i32) {
    %c0_i32 = arith.constant 0 : i32
    %c0_i32_0 = arith.constant 0 : i32
    %c0_i32_1 = arith.constant 0 : i32
    return %c0_i32, %c0_i32_0 : i32, i32
  }
  func.func @transform_2(%arg0: i32) -> (i32, i32) {
    %c0_i32 = arith.constant 0 : i32
    %c0_i32_0 = arith.constant 0 : i32
    %c0_i32_1 = arith.constant 0 : i32
    return %c0_i32, %c0_i32_0 : i32, i32
  }
  func.func @transform_3(%arg0: i32) -> (i32, i32) {
    %c0_i32 = arith.constant 0 : i32
    %c0_i32_0 = arith.constant 0 : i32
    %c0_i32_1 = arith.constant 0 : i32
    return %c0_i32, %c0_i32_0 : i32, i32
  }
  func.func @transform_4(%arg0: i32) -> (i32, i32) {
    %c0_i32 = arith.constant 0 : i32
    %c0_i32_0 = arith.constant 0 : i32
    %c0_i32_1 = arith.constant 0 : i32
    return %c0_i32, %c0_i32_0 : i32, i32
  }
  func.func @transform_5(%arg0: i32) -> (i32, i32) {
    %c0_i32 = arith.constant 0 : i32
    %c0_i32_0 = arith.constant 0 : i32
    %c0_i32_1 = arith.constant 0 : i32
    return %c0_i32, %c0_i32_0 : i32, i32
  }
  func.func @transform_6(%arg0: i32) -> (i32, i32) {
    %c0_i32 = arith.constant 0 : i32
    %c0_i32_0 = arith.constant 0 : i32
    %c0_i32_1 = arith.constant 0 : i32
    return %c0_i32, %c0_i32_0 : i32, i32
  }
  func.func @transform_7(%arg0: i32) -> (i32, i32) {
    %c0_i32 = arith.constant 0 : i32
    %c0_i32_0 = arith.constant 0 : i32
    %c0_i32_1 = arith.constant 0 : i32
    return %c0_i32, %c0_i32_0 : i32, i32
  }
  func.func @transform_8(%arg0: i32) -> (i32, i32) {
    %c0_i32 = arith.constant 0 : i32
    %c0_i32_0 = arith.constant 0 : i32
    %c0_i32_1 = arith.constant 0 : i32
    return %c0_i32, %c0_i32_0 : i32, i32
  }
  func.func @transform_9(%arg0: i32) -> (i32, i32) {
    %c0_i32 = arith.constant 0 : i32
    %c0_i32_0 = arith.constant 0 : i32
    %c0_i32_1 = arith.constant 0 : i32
    return %c0_i32, %c0_i32_0 : i32, i32
  }
  func.func @transform_10(%arg0: i32) -> (i32, i32) {
    %c0_i32 = arith.constant 0 : i32
    %c0_i32_0 = arith.constant 0 : i32
    %c0_i32_1 = arith.constant 0 : i32
    return %c0_i32, %c0_i32_0 : i32, i32
  }
  func.func @transform_11(%arg0: i32) -> (i32, i32) {
    %c0_i32 = arith.constant 0 : i32
    %c0_i32_0 = arith.constant 0 : i32
    %c0_i32_1 = arith.constant 0 : i32
    return %c0_i32, %c0_i32_0 : i32, i32
  }
  func.func @transform_12(%arg0: i32) -> (i32, i32) {
    %c0_i32 = arith.constant 0 : i32
    %c0_i32_0 = arith.constant 0 : i32
    %c0_i32_1 = arith.constant 0 : i32
    return %c0_i32, %c0_i32_0 : i32, i32
  }
  func.func @transform_13(%arg0: i32) -> (i32, i32) {
    %c0_i32 = arith.constant 0 : i32
    %c0_i32_0 = arith.constant 0 : i32
    %c0_i32_1 = arith.constant 0 : i32
    return %c0_i32, %c0_i32_0 : i32, i32
  }
  func.func @transform_14(%arg0: i32) -> (i32, i32) {
    %c0_i32 = arith.constant 0 : i32
    %c0_i32_0 = arith.constant 0 : i32
    %c0_i32_1 = arith.constant 0 : i32
    return %c0_i32, %c0_i32_0 : i32, i32
  }
  func.func @transform_15(%arg0: i32) -> (i32, i32) {
    %c0_i32 = arith.constant 0 : i32
    %c0_i32_0 = arith.constant 0 : i32
    %c0_i32_1 = arith.constant 0 : i32
    return %c0_i32, %c0_i32_0 : i32, i32
  }
  func.func @transform_16(%arg0: i32) -> (i32, i32) {
    %c0_i32 = arith.constant 0 : i32
    %c0_i32_0 = arith.constant 0 : i32
    %c0_i32_1 = arith.constant 0 : i32
    return %c0_i32, %c0_i32_0 : i32, i32
  }
  func.func @transform_17(%arg0: i32) -> (i32, i32) {
    %c0_i32 = arith.constant 0 : i32
    %c0_i32_0 = arith.constant 0 : i32
    %c0_i32_1 = arith.constant 0 : i32
    return %c0_i32, %c0_i32_0 : i32, i32
  }
  func.func @transform_18(%arg0: i32) -> (i32, i32) {
    %c0_i32 = arith.constant 0 : i32
    %c0_i32_0 = arith.constant 0 : i32
    %c0_i32_1 = arith.constant 0 : i32
    return %c0_i32, %c0_i32_0 : i32, i32
  }
  func.func @transform_19(%arg0: i32) -> (i32, i32) {
    %c0_i32 = arith.constant 0 : i32
    %c0_i32_0 = arith.constant 0 : i32
    %c0_i32_1 = arith.constant 0 : i32
    return %c0_i32, %c0_i32_0 : i32, i32
  }
  func.func @transform_20(%arg0: i32) -> (i32, i32) {
    %c0_i32 = arith.constant 0 : i32
    %c0_i32_0 = arith.constant 0 : i32
    %c0_i32_1 = arith.constant 0 : i32
    return %c0_i32, %c0_i32_0 : i32, i32
  }
  func.func @transform_21(%arg0: i32) -> (i32, i32, i32) {
    %c0_i32 = arith.constant 0 : i32
    %c0_i32_0 = arith.constant 0 : i32
    %c0_i32_1 = arith.constant 0 : i32
    return %arg0, %c0_i32, %c0_i32_0 : i32, i32, i32
  }
}

</mosaic_0001>

<bundles_post_ra>
// kernel: tpu_custom_call.1
= control target key start
LH: loop header
LB: loop body
LE: loop exit
PB: predicated region body
PF: predicated region fallthrough
CT: control target
= control target key end

     0   :  { %s3903_s0 = inlined_call_operand.hbm [shape: f32[2,16,128], index: 0, kind: input, shape index: {}]   ;;  %s3904_s1 = inlined_call_operand.hbm [shape: f32[128,384], index: 1, kind: input, shape index: {}]   ;;  %s3905_s2 = inlined_call_operand.vmem [shape: f32[1,128], index: 2, kind: input, shape index: {}]   ;;  %s3906_s3 = inlined_call_operand.vmem [shape: f32[1,128], index: 3, kind: input, shape index: {}]   ;;  %s3907_s4 = inlined_call_operand.<no memory space> [shape: f32[1,1], index: 4, kind: input, shape index: {}]   ;;  %s3908_s5 = inlined_call_operand.hbm [shape: f32[128,384], index: 5, kind: input, shape index: {}]   ;;  %s3909_s6 = inlined_call_operand.vmem [shape: f32[1,128], index: 6, kind: input, shape index: {}]   ;;  %s3910_s7 = inlined_call_operand.vmem [shape: f32[1,128], index: 7, kind: input, shape index: {}]   ;;  %s3911_s9 = inlined_call_operand.hbm [shape: f32[128,128], index: 9, kind: input, shape index: {}]   ;;  %s3912_s10 = inlined_call_operand.vmem [shape: f32[1,128], index: 10, kind: input, shape index: {}]   ;;  %s3913_s11 = inlined_call_operand.hbm [shape: f32[128,384], index: 11, kind: input, shape index: {}]   ;;  %s3914_s12 = inlined_call_operand.vmem [shape: f32[1,128], index: 12, kind: input, shape index: {}]   ;;  %s3915_s13 = inlined_call_operand.vmem [shape: f32[1,128], index: 13, kind: input, shape index: {}]   ;;  %s3916_s15 = inlined_call_operand.hbm [shape: f32[128,384], index: 15, kind: input, shape index: {}]   ;;  %s3917_s16 = inlined_call_operand.vmem [shape: f32[1,128], index: 16, kind: input, shape index: {}]   ;;  %s3918_s17 = inlined_call_operand.vmem [shape: f32[1,128], index: 17, kind: input, shape index: {}]   ;;  %s3919_s19 = inlined_call_operand.hbm [shape: f32[128,128], index: 19, kind: input, shape index: {}]   ;;  %s3920_s20 = inlined_call_operand.vmem [shape: f32[1,128], index: 20, kind: input, shape index: {}]   ;;  %s3921_s21 = inlined_call_operand.hbm [shape: f32[2,1,128], index: 21, kind: output, shape index: {}]   ;;  %s3922_s8 = inlined_call_operand.<no memory space> [shape: f32[1,1], index: 8, kind: input, shape index: {}]   ;;  %s3923_s14 = inlined_call_operand.<no memory space> [shape: f32[1,1], index: 14, kind: input, shape index: {}]   ;;  %s3924_s18 = inlined_call_operand.<no memory space> [shape: f32[1,1], index: 18, kind: input, shape index: {}]  }
   0x1   :  { %3939 = sst [smem:[#allocation25_spill]] %s3903_s0  ;;  %v28_v1 = vstv %s3922_s8  ;;  %v30_v2 = vstv %s3923_s14  ;;  %v32_v3 = vstv %s3924_s18 }
   0x2   :  { %3940 = sst [smem:[#allocation26_spill]] %s3904_s1  ;;  %29 = vst [vmem:[#allocation4] sm:$0x1] %v28_v1  ;;  %31 = vst [vmem:[#allocation5] sm:$0x1] %v30_v2 }
   0x3   :  { %3941 = sst [smem:[#allocation27_spill]] %s3905_s2  ;;  %33 = vst [vmem:[#allocation6] sm:$0x1] %v32_v3 }
   0x4   :  { %3942 = sst [smem:[#allocation28_spill]] %s3906_s3 }
   0x5   :  { %3943 = sst [smem:[#allocation29_spill]] %s3907_s4 }
   0x6   :  { %3944 = sst [smem:[#allocation30_spill]] %s3908_s5  ;;  %s3953_s26 = sld [smem:[#allocation29_spill]] }
   0x7   :  { %3945 = sst [smem:[#allocation31_spill]] %s3911_s9 }
   0x8   :  { %3946 = sst [smem:[#allocation32_spill]] %s3913_s11 }
   0x9   :  { %3947 = sst [smem:[#allocation33_spill]] %s3915_s13 }
   0xa   :  { %3948 = sst [smem:[#allocation34_spill]] %s3916_s15 }
   0xb   :  { %3949 = sst [smem:[#allocation35_spill]] %s3917_s16 }
   0xc   :  { %3950 = sst [smem:[#allocation36_spill]] %s3918_s17  ;;  %v26_v0 = vstv %s3953_s26 }
   0xd   :  { %3951 = sst [smem:[#allocation37_spill]] %s3920_s20  ;;  %27 = vst [vmem:[#allocation3] sm:$0x1] %v26_v0 }
   0xe   :  { %3952 = sst [smem:[#allocation38_spill]] %s3921_s21 }
   0xf   :  { %34 = vsyncpa [#allocation8], 0 }
  0x10   :  { %36 = vsyncpa [#allocation8 + $0x1], 0 }
  0x11   :  { %37 = vsyncpa [#allocation11], 0 }
  0x12   :  { %38 = vsyncpa [#allocation14], 0 }
  0x13   :  { %39 = vsyncpa [#allocation17], 0 }
  0x14   :  { %40 = vsyncpa [#allocation9], 0 }
  0x15   :  { %42 = vsyncpa [#allocation9 + $0x1], 0  ;;  %s3406_s8 = smov 0   ;;  %s3408_s30 = smov 0  }
  0x16   :  { %s3410_s14 = smov 0   ;;  %s3412_s5 = smov 0  }
  0x17 LB: > { %s3268_s18 = smov [#allocation10]   ;;  %s3427_s23 = sadd.s32 4294967295, %s3266_s5   ;;  %s3266_s5 = sphi %s3412_s5, %s3992_s5   ;;  %s3262_s14 = sphi %s3410_s14, %s3991_s14   ;;  %s3258_s30 = sphi %s3408_s30, %s3990_s30   ;;  %s3254_s8 = sphi %s3406_s8, %s3989_s8  }
  0x18   : > { %s537_s22 = sshll.u32 %s3268_s18, 4  ;;  %p2212_p0 = scmp.ge.s32.totalorder %s3266_s5, 1  ;;  %s3432_s22 = int_to_ptr.vmem [resolvable:$true] %s537_s22 }
  0x19   : > { %p3931_p1 = scmp.eq.s32.totalorder %s3427_s23, 0  ;;  %p525_p2 = scmp.lt.s32.totalorder %s3266_s5, 3 }
  0x1a   : > { %s3269_s24 = smov [#allocation13]   ;;  %s3270_s26 = smov [#allocation16]  }
  0x1b   : > { %p3434_p3 = pnand %p2212_p0, %p525_p2  ;;  %s581_s2 = sshll.u32 %s3269_s24, 4  ;;  %s3447_s2 = int_to_ptr.vmem [resolvable:$true] %s581_s2 }
  0x1c   : > { %s3449_s27 = sshll.u32 %s3270_s26, 4  ;;  %s3956_s29 = sld [smem:[#allocation26_spill]]  ;;  %s620_s27 = int_to_ptr.vmem [resolvable:$true] %s3449_s27 }
  0x1d   : > { %s3954_s1 = scalar_select %p3434_p3, 1, 0 }
  0x1e   : > { %p2901_p5 = pneg %p3434_p3 }
  0x20   : > { %p3443_p6 = pnand %p2901_p5, %p3931_p1 }
  0x22   : > { %s2990_s0 = scalar_lea.hbm %s3956_s29, 6144  ;;  %p3459_p8 = pneg %p3443_p6 }
  0x23   : > { %p2991_p7 = scmp.ne.s32.totalorder %s3956_s29, %s2990_s0  ;;  %p2997_p11 = scmp.lt.u32.totalorder %s2990_s0, %s3956_s29 }
  0x25   : > { %p2993_p9 = pnand %p3459_p8, %p2991_p7 }
  0x27   : > { %p2994_p10 = pneg %p2993_p9 }
  0x29   : > { %p2999_p12 = pnand %p2997_p11, %p2994_p10 }
  0x2b   : > { %3002 = shalt.err (!%p2999_p12)
}
  0x2c   : > { %s3003_s3 = scalar_lea.vmem %s3432_s22, 6144  ;;  %p3011_p5 = scmp.lt.s32.totalorder %s3432_s22, %s3432_s22 }
  0x2d   : > { %p3004_p13 = scmp.ne.s32.totalorder %s3432_s22, %s3003_s3  ;;  %p3012_p4 = scmp.lt.s32.totalorder %s3003_s3, %s3003_s3 }
  0x2f   : > { %p3006_p0 = pnand %p3004_p13, %p3459_p8  ;;  %p3013_p7 = por %p3012_p4, %p3011_p5 }
  0x31   : > { %p3007_p2 = pneg %p3006_p0 }
  0x33   : > { %p3014_p9 = pnand %p3013_p7, %p3007_p2 }
  0x35   : > { %3017 = shalt.err (!%p3014_p9)
}
  0x36   : > { %s3929_s28 = smov 384   ;;  %s3272_s21 = smov 24  }
  0x37   : > { %2904 = dma.hbm_to_vmem [thread:$0]  (!%p3443_p6), %s3956_s29, 6144, %s3432_s22, [#allocation11], %s3929_s28, %s3929_s28, %s3272_s21  }
  0x38   : > { %s3958_s9 = sld [smem:[#allocation31_spill]] }
  0x3e   : > { %s3018_s3 = scalar_lea.hbm %s3958_s9, 2048 }
  0x3f   : > { %p3019_p4 = scmp.ne.s32.totalorder %s3958_s9, %s3018_s3  ;;  %p3025_p12 = scmp.lt.u32.totalorder %s3018_s3, %s3958_s9 }
  0x41   : > { %p3021_p10 = pnand %p3019_p4, %p3459_p8 }
  0x43   : > { %p3022_p11 = pneg %p3021_p10 }
  0x45   : > { %p3027_p13 = pnand %p3025_p12, %p3022_p11 }
  0x47   : > { %3030 = shalt.err (!%p3027_p13)
}
  0x48   : > { %s3031_s22 = scalar_lea.vmem %s3447_s2, 2048  ;;  %p3039_p7 = scmp.lt.s32.totalorder %s3447_s2, %s3447_s2 }
  0x49   : > { %p3032_p0 = scmp.ne.s32.totalorder %s3447_s2, %s3031_s22  ;;  %p3040_p9 = scmp.lt.s32.totalorder %s3031_s22, %s3031_s22 }
  0x4b   : > { %p3034_p2 = pnand %p3032_p0, %p3459_p8  ;;  %p3041_p4 = por %p3040_p9, %p3039_p7 }
  0x4d   : > { %p3035_p5 = pneg %p3034_p2 }
  0x4f   : > { %p3042_p10 = pnand %p3041_p4, %p3035_p5 }
  0x51   : > { %3045 = shalt.err (!%p3042_p10)
}
  0x52   : > { %s3933_s17 = smov 128   ;;  %s3935_s13 = smov 8  }
  0x53   : > { %2910 = dma.hbm_to_vmem [thread:$0]  (!%p3443_p6), %s3958_s9, 2048, %s3447_s2, [#allocation14], %s3933_s17, %s3933_s17, %s3935_s13  }
  0x54   : > { %s3959_s15 = sld [smem:[#allocation34_spill]] }
  0x5a   : > { %s3046_s18 = scalar_lea.hbm %s3959_s15, 6144 }
  0x5b   : > { %p3047_p11 = scmp.ne.s32.totalorder %s3959_s15, %s3046_s18  ;;  %p3053_p0 = scmp.lt.u32.totalorder %s3046_s18, %s3959_s15 }
  0x5d   : > { %p3049_p12 = pnand %p3047_p11, %p3459_p8 }
  0x5f   : > { %p3050_p13 = pneg %p3049_p12 }
  0x61   : > { %p3055_p2 = pnand %p3053_p0, %p3050_p13 }
  0x63   : > { %3058 = shalt.err (!%p3055_p2)
}
  0x64   : > { %s3059_s16 = scalar_lea.vmem %s620_s27, 6144  ;;  %p3067_p4 = scmp.lt.s32.totalorder %s620_s27, %s620_s27 }
  0x65   : > { %p3060_p5 = scmp.ne.s32.totalorder %s620_s27, %s3059_s16  ;;  %p3068_p10 = scmp.lt.s32.totalorder %s3059_s16, %s3059_s16 }
  0x67   : > { %p3062_p7 = pnand %p3060_p5, %p3459_p8  ;;  %p3069_p1 = por %p3068_p10, %p3067_p4 }
  0x69   : > { %p3063_p9 = pneg %p3062_p7 }
  0x6b   : > { %p3070_p3 = pnand %p3069_p1, %p3063_p9 }
  0x6d   : > { %3073 = shalt.err (!%p3070_p3)
}
  0x6e   : > { %s3960_s2 = smov 384   ;;  %s3275_s0 = smov [#allocation12]  }
  0x6f   : > { %2916 = dma.hbm_to_vmem [thread:$0]  (!%p3443_p6), %s3959_s15, 6144, %s620_s27, [#allocation17], %s3960_s2, %s3960_s2, %s3272_s21  }
  0x70   : > { %s559_s4 = sshll.u32 %s3275_s0, 4  ;;  %s3276_s18 = smov [#allocation15]   ;;  %s560_s4 = int_to_ptr.vmem [resolvable:$true] %s559_s4 }
  0x71   : > { %s597_s26 = sshll.u32 %s3276_s18, 4  ;;  %s3961_s16 = sld [smem:[#allocation30_spill]]  ;;  %s598_s26 = int_to_ptr.vmem [resolvable:$true] %s597_s26 }
  0x77   : > { %s3074_s17 = scalar_lea.hbm %s3961_s16, 6144 }
  0x78   : > { %p3075_p1 = scmp.ne.s32.totalorder %s3961_s16, %s3074_s17  ;;  %p3081_p12 = scmp.lt.u32.totalorder %s3074_s17, %s3961_s16 }
  0x7a   : > { %p3077_p3 = pnand %p3075_p1, %p3459_p8 }
  0x7c   : > { %p3078_p11 = pneg %p3077_p3 }
  0x7e   : > { %p3083_p13 = pnand %p3081_p12, %p3078_p11 }
  0x80   : > { %3086 = shalt.err (!%p3083_p13)
}
  0x81   : > { %s3087_s27 = scalar_lea.vmem %s560_s4, 6144  ;;  %p3095_p7 = scmp.lt.s32.totalorder %s560_s4, %s560_s4 }
  0x82   : > { %p3088_p0 = scmp.ne.s32.totalorder %s560_s4, %s3087_s27  ;;  %p3096_p9 = scmp.lt.s32.totalorder %s3087_s27, %s3087_s27 }
  0x84   : > { %p3090_p2 = pnand %p3088_p0, %p3459_p8  ;;  %p3097_p4 = por %p3096_p9, %p3095_p7 }
  0x86   : > { %p3091_p5 = pneg %p3090_p2 }
  0x88   : > { %p3098_p10 = pnand %p3097_p4, %p3091_p5 }
  0x8a   : > { %3101 = shalt.err (!%p3098_p10)
}
  0x8b   : > { %2907 = dma.hbm_to_vmem [thread:$0]  (!%p3443_p6), %s3961_s16, 6144, %s560_s4, [#allocation11], %s3960_s2, %s3960_s2, %s3272_s21  }
  0x8c   : > { %s3962_s11 = sld [smem:[#allocation32_spill]] }
  0x92   : > { %s3102_s20 = scalar_lea.hbm %s3962_s11, 6144 }
  0x93   : > { %p3103_p1 = scmp.ne.s32.totalorder %s3962_s11, %s3102_s20  ;;  %p3109_p12 = scmp.lt.u32.totalorder %s3102_s20, %s3962_s11 }
  0x95   : > { %p3105_p3 = pnand %p3103_p1, %p3459_p8 }
  0x97   : > { %p3106_p11 = pneg %p3105_p3 }
  0x99   : > { %p3111_p13 = pnand %p3109_p12, %p3106_p11 }
  0x9b   : > { %3114 = shalt.err (!%p3111_p13)
}
  0x9c   : > { %s3115_s28 = scalar_lea.vmem %s598_s26, 6144  ;;  %p3123_p7 = scmp.lt.s32.totalorder %s598_s26, %s598_s26 }
  0x9d   : > { %p3116_p0 = scmp.ne.s32.totalorder %s598_s26, %s3115_s28  ;;  %p3124_p9 = scmp.lt.s32.totalorder %s3115_s28, %s3115_s28 }
  0x9f   : > { %p3118_p2 = pnand %p3116_p0, %p3459_p8  ;;  %p3125_p4 = por %p3124_p9, %p3123_p7 }
  0xa1   : > { %p3119_p5 = pneg %p3118_p2 }
  0xa3   : > { %p3126_p10 = pnand %p3125_p4, %p3119_p5 }
  0xa5   : > { %3129 = shalt.err (!%p3126_p10)
}
  0xa6   : > { %2913 = dma.hbm_to_vmem [thread:$0]  (!%p3443_p6), %s3962_s11, 6144, %s598_s26, [#allocation14], %s3960_s2, %s3960_s2, %s3272_s21  }
  0xa7   : > { %s3277_s9 = smov [#allocation18]   ;;  %s3130_s20 = scalar_lea.hbm %s3919_s19, 2048 }
  0xa8   : > { %s641_s29 = sshll.u32 %s3277_s9, 4  ;;  %p3131_p1 = scmp.ne.s32.totalorder %s3919_s19, %s3130_s20  ;;  %s642_s29 = int_to_ptr.vmem [resolvable:$true] %s641_s29 }
  0xa9   : > { %p3137_p12 = scmp.lt.u32.totalorder %s3130_s20, %s3919_s19 }
  0xaa   : > { %p3133_p3 = pnand %p3131_p1, %p3459_p8 }
  0xac   : > { %p3134_p11 = pneg %p3133_p3 }
  0xae   : > { %p3139_p13 = pnand %p3137_p12, %p3134_p11 }
  0xb0   : > { %3142 = shalt.err (!%p3139_p13)
}
  0xb1   : > { %s3143_s21 = scalar_lea.vmem %s642_s29, 2048  ;;  %p3151_p7 = scmp.lt.s32.totalorder %s642_s29, %s642_s29 }
  0xb2   : > { %p3144_p0 = scmp.ne.s32.totalorder %s642_s29, %s3143_s21  ;;  %p3152_p9 = scmp.lt.s32.totalorder %s3143_s21, %s3143_s21 }
  0xb4   : > { %p3146_p2 = pnand %p3144_p0, %p3459_p8  ;;  %p3153_p4 = por %p3152_p9, %p3151_p7 }
  0xb6   : > { %p3147_p5 = pneg %p3146_p2 }
  0xb8   : > { %p3154_p10 = pnand %p3153_p4, %p3147_p5 }
  0xba   : > { %3157 = shalt.err (!%p3154_p10)
}
  0xbb   : > { %s3963_s2 = smov 8   ;;  %s3964_s26 = smov 128  }
  0xbc   : > { %2919 = dma.hbm_to_vmem [thread:$0]  (!%p3443_p6), %s3919_s19, 2048, %s642_s29, [#allocation17], %s3964_s26, %s3964_s26, %s3963_s2  }
  0xbd   : > { %s2211_s25 = sadd.s32 4294967294, %s3266_s5   ;;  %s3596_s24 = sadd.s32 1, %s3266_s5  }
  0xbe   : > { %s52_s27 = ssub.s32 %s3266_s5, %s3596_s24  ;;  %s55_s9 = sadd.s32 1, %s3262_s14 }
  0xbf   : > { %p53_p8 = scmp.eq.s32.totalorder %s52_s27, 0  ;;  %p62_p1 = scmp.ne.s32.totalorder %s3262_s14, %s3258_s30 }
  0xc0   : > { %p63_p3 = scmp.eq.s32.totalorder %s3266_s5, 0  ;;  %p68_p11 = scmp.ne.s32.totalorder %s3258_s30, %s3254_s8 }
  0xc1   : > { %s3607_s17 = scalar_select %p53_p8, %s3262_s14, %s55_s9  }
  0xc2   : > { %p3609_p12 = por %p63_p3, %p62_p1  ;;  %p3966_p13 = scmp.eq.s32.totalorder %s3427_s23, 0 }
  0xc3   : > { %p512_p0 = scmp.eq.s32.totalorder %s3427_s23, 1  ;;  %p518_p2 = scmp.eq.s32.totalorder %s2211_s25, 1 }
  0xc4   : > { %p3615_p6 = por %p3966_p13, %p68_p11  ;;  %p2934_p5 = scmp.lt.s32.totalorder %s3266_s5, 2 }
  0xc5   : > { %s658_s20 = sand.u32 1, %s3262_s14   ;;  %p3622_p7 = por %p512_p0, %p62_p1 }
  0xc6   : > { %p3626_p9 = por %p518_p2, %p68_p11  ;;  %s2220_s3 = sshll.u32 %s658_s20, 4 }
  0xc7   : > { %s3968_s0 = scalar_select %p3622_p7, 1, 0 }
  0xc8   : > { %s3969_s18 = scalar_select %p3626_p9, 1, 0 }
  0xc9   : > { %s2247_s22 = sshll.u32 %s3266_s5, 8  ;;  %s3970_s4 = sld [smem:[#allocation25_spill]] }
  0xca   : > { %s662_s25 = scalar_lea.vmem [#allocation7], %s2220_s3  ;;  %p3640_p4 = pnand %p2934_p5, %p3609_p12 }
  0xcb   : > { %s669_s9 = sshll.u32 %s662_s25, 4  ;;  %s3644_s15 = scalar_lea.sflag [#allocation8], %s658_s20  ;;  %s3636_s9 = int_to_ptr.vmem [resolvable:$true] %s669_s9 }
  0xcc   : > { %p3160_p8 = pneg %p3640_p4 }
  0xcf   : > { %s3634_s27 = scalar_lea.hbm %s3970_s4, %s2247_s22  ;;  %s3163_s13 = scalar_lea.hbm %s3970_s4, 512 }
  0xd0   : > { %s3158_s21 = scalar_lea.hbm %s3634_s27, 256  ;;  %p3164_p11 = scmp.lt.u32.totalorder %s3634_s27, %s3970_s4 }
  0xd1   : > { %p3159_p10 = scmp.ne.s32.totalorder %s3634_s27, %s3158_s21  ;;  %p3165_p12 = scmp.lt.u32.totalorder %s3163_s13, %s3158_s21 }
  0xd2   : > { %p3167_p0 = scmp.lt.u32.totalorder %s3158_s21, %s3634_s27 }
  0xd3   : > { %p3161_p1 = pnand %p3160_p8, %p3159_p10  ;;  %p3166_p13 = por %p3165_p12, %p3164_p11 }
  0xd5   : > { %p3162_p3 = pneg %p3161_p1  ;;  %p3168_p2 = por %p3167_p0, %p3166_p13 }
  0xd7   : > { %p3169_p5 = pnand %p3168_p2, %p3162_p3 }
  0xd9   : > { %3172 = shalt.err (!%p3169_p5)
}
  0xda   : > { %s3173_s20 = scalar_lea.vmem %s3636_s9, 256  ;;  %s3278_s3 = smov [#allocation7]  }
  0xdb   : > { %p3174_p10 = scmp.ne.s32.totalorder %s3636_s9, %s3173_s20  ;;  %s3178_s22 = sshll.u32 %s3278_s3, 4  ;;  %s3179_s22 = int_to_ptr.vmem [resolvable:$false] %s3178_s22 }
  0xdc   : > { %s3180_s28 = scalar_lea.vmem %s3179_s22, 512  ;;  %p3181_p7 = scmp.lt.s32.totalorder %s3636_s9, %s3179_s22 }
  0xdd   : > { %p3176_p1 = pnand %p3174_p10, %p3160_p8  ;;  %p3182_p11 = scmp.lt.s32.totalorder %s3180_s28, %s3173_s20 }
  0xdf   : > { %p3177_p9 = pneg %p3176_p1  ;;  %p3183_p12 = por %p3182_p11, %p3181_p7 }
  0xe1   : > { %p3184_p13 = pnand %p3183_p12, %p3177_p9 }
  0xe3   : > { %3187 = shalt.err (!%p3184_p13)
}
  0xe4   : > { %2923 = dma.hbm_to_vmem [thread:$0]  (!%p3640_p4), %s3634_s27, 256, %s3636_s9, %s3644_s15, %s3964_s26, %s3964_s26, %s3963_s2  }
  0xe5   : > { %p3972_p8 = scmp.ne.s32.totalorder %s3954_s1, 0 }
  0xe6   : > { %s3678_s21 = sand.u32 (!%p3972_p8), 1, %s3258_s30  }
  0xe7   : > { %681 = sbr.rel (%p3972_p8) target bundleno = 1499 (0x5db), region = 104  ;;  %s2224_s13 = sshll.u32 (!%p3972_p8), %s3678_s21, 4 }
  0xe8   : > { %s684_s25 = scalar_lea.sflag (!%p3972_p8), [#allocation8], %s3678_s21  ;;  %s3682_s20 = scalar_lea.vmem (!%p3972_p8), [#allocation7], %s2224_s13 }
  0xee   : > { %3233 = dma.done.wait (%p3615_p6), %s684_s25, 256  }
  0xef   : > { %3235 = vsyncadd (%p3615_p6), %s684_s25, 4294967040  ;;  %p3973_p7 = scmp.eq.s32.totalorder %s3427_s23, 0 }
  0xf1   : > { %3237 = dma.done.wait (%p3973_p7), [#allocation11], 12288   ;;  %p3974_p9 = pmov %p3973_p7 }
  0xf2   : > { %p3975_p4 = pmov %p3973_p7 }
  0xf3   : > { %3239 = vsyncadd (%p3974_p9), [#allocation11], 4294955008 }
  0xf4   : > { %3241 = dma.done.wait (%p3975_p4), [#allocation14], 8192   ;;  %p3976_p3 = pmov %p3975_p4 }
  0xf6   : > { %3243 = vsyncadd (%p3976_p3), [#allocation14], 4294959104  ;;  %p3977_p0 = pmov %p3976_p3 }
  0xf8   : > { %3245 = dma.done.wait (%p3977_p0), [#allocation17], 8192   ;;  %p3978_p2 = pmov %p3977_p0 }
  0xf9   : > { %v3279_v4 = vmov 0.0|0.0   ;;  %vm3280_vm0 = vmmov 0   ;;  %v3281_v5 = vmov 0.0   ;;  %v3282_v6 = vmov 0   ;;  %v780_v7 = vld [vmem:[#allocation10 + $0x8] sm:$0xff]  ;;  %v783_v8 = vld [vmem:[#allocation10 + $0x20] sm:$0xff] }
  0xfa   : > { %3247 = vsyncadd (%p3978_p2), [#allocation17], 4294959104  ;;  %2625 = vmatprep.subr.bf16.mxu1 %v3279_v4  ;;  %2391 = vmatprep.mubr.msk.f32.mxu1 %vm3280_vm0, %v3281_v5  ;;  %771 = vst [vmem:[#allocation2] sm:$0xff] %v3281_v5  ;;  %v781_v9 = vld [vmem:[#allocation10 + $0x10] sm:$0xff]  ;;  %v2593_v10 = vpack.c.bf16 %v783_v8, %v780_v7  ;;  %v784_v11 = vld [vmem:[#allocation10 + $0x28] sm:$0xff]  ;;  %vm1005_vm1 = vcmask 1045504  }
  0xfb   : > { %772 = vst [vmem:[#allocation2 + $0x8] sm:$0xff] %v3281_v5  ;;  %773 = vst [vmem:[#allocation2 + $0x10] sm:$0xf] %v3281_v5  ;;  %891 = vmatprep.mubr.f32.mxu0 %v3281_v5  ;;  %2988 = vset.pattern.permute.xlu0 %v3282_v6  ;;  %v779_v12 = vld [vmem:[#allocation10] sm:$0xff]  ;;  %v782_v13 = vld [vmem:[#allocation10 + $0x18] sm:$0xff]  ;;  %v2626_v14 = vpack.c.bf16 %v784_v11, %v781_v9  ;;  %vm992_vm2 = vcmask 1046528  }
  0xfc   : > { %2989 = vset.pattern.permute.xlu1 %v3282_v6  ;;  %v2595_v15 = vpack.c.bf16 %v782_v13, %v779_v12  ;;  %v786_v16 = vld [vmem:[#allocation10 + $0x38] sm:$0xff]  ;;  %v789_v17 = vld [vmem:[#allocation10 + $0x50] sm:$0xff]  ;;  %v787_v18 = vld [vmem:[#allocation10 + $0x40] sm:$0xff]  ;;  %2594 = vmatprep.subr.bf16.mxu0 %v2593_v10  ;;  %s3979_s1 = sld [smem:[#allocation27_spill]]  ;;  %s3980_s29 = sld [smem:[#allocation28_spill]]  ;;  %vm1658_vm7 = vcmask 1043456  }
  0xfd   : > { %v2597_v19 = vpack.c.bf16 %v789_v17, %v786_v16  ;;  %v790_v20 = vld [vmem:[#allocation10 + $0x58] sm:$0xff]  ;;  %v785_v21 = vld [vmem:[#allocation10 + $0x30] sm:$0xff]  ;;  %v788_v22 = vld [vmem:[#allocation10 + $0x48] sm:$0xff]  ;;  %2627 = vmatpush3.bf16.msra.mxu1 %v2626_v14  ;;  %s3983_s3 = sld [smem:[#allocation36_spill]]  ;;  %s3984_s13 = sld [smem:[#allocation37_spill]] }
  0xfe   : > { %2596 = vmatpush1.bf16.msra.mxu0 %v2595_v15  ;;  %v2629_v23 = vpack.c.bf16 %v790_v20, %v787_v18  ;;  %v2599_v24 = vpack.c.bf16 %v788_v22, %v785_v21  ;;  %v792_v25 = vld [vmem:[#allocation10 + $0x68] sm:$0xff]  ;;  %v795_v26 = vld [vmem:[#allocation10 + $0x80] sm:$0xff]  ;;  %v793_v27 = vld [vmem:[#allocation10 + $0x70] sm:$0xff]  ;;  %2628 = vmatprep.subr.bf16.mxu1 %v3279_v4  ;;  %s2244_s25 = sshll.u32 %s3427_s23, 4  ;;  %s3985_s2 = sld [smem:[#allocation38_spill]] }
  0xff   : > { %2598 = vmatprep.subr.bf16.mxu0 %v2597_v19  ;;  %v2601_v28 = vpack.c.bf16 %v795_v26, %v792_v25  ;;  %v796_v29 = vld [vmem:[#allocation10 + $0x88] sm:$0xff]  ;;  %v791_v30 = vld [vmem:[#allocation10 + $0x60] sm:$0xff]  ;;  %v794_v31 = vld [vmem:[#allocation10 + $0x78] sm:$0xff]  ;;  %p3986_p5 = scmp.ne.s32.totalorder %s3968_s0, 0  ;;  %s3283_s23 = smov [#allocation19]  }
 0x100   : > { %v798_v32 = vld [vmem:[#allocation10 + $0x98] sm:$0xff]  ;;  %v801_v33 = vld [vmem:[#allocation10 + $0xb0] sm:$0xff]  ;;  %v2632_v34 = vpack.c.bf16 %v796_v29, %v793_v27  ;;  %v2603_v35 = vpack.c.bf16 %v794_v31, %v791_v30  ;;  %v799_v36 = vld [vmem:[#allocation10 + $0xa0] sm:$0xff]  ;;  %s3192_s9 = sshll.u32 %s3283_s23, 4  ;;  %s3193_s9 = int_to_ptr.vmem [resolvable:$false] %s3192_s9 }
 0x101   : > { %2630 = vmatpush3.bf16.msra.mxu1 %v2629_v23  ;;  %v2605_v37 = vpack.c.bf16 %v801_v33, %v798_v32  ;;  %v802_v38 = vld [vmem:[#allocation10 + $0xb8] sm:$0xff]  ;;  %v797_v39 = vld [vmem:[#allocation10 + $0x90] sm:$0xff]  ;;  %v800_v40 = vld [vmem:[#allocation10 + $0xa8] sm:$0xff] }
 0x102   : > { %2600 = vmatpush1.bf16.msra.mxu0 %v2599_v24  ;;  %2631 = vmatprep.subr.bf16.mxu1 %v3279_v4  ;;  %v804_v41 = vld [vmem:[#allocation10 + $0xc8] sm:$0xff]  ;;  %v807_v42 = vld [vmem:[#allocation10 + $0xe0] sm:$0xff]  ;;  %v2635_v43 = vpack.c.bf16 %v802_v38, %v799_v36  ;;  %v2607_v44 = vpack.c.bf16 %v800_v40, %v797_v39  ;;  %v805_v45 = vld [vmem:[#allocation10 + $0xd0] sm:$0xff] }
 0x103   : > { %2602 = vmatprep.subr.bf16.mxu0 %v2601_v28  ;;  %v2609_v46 = vpack.c.bf16 %v807_v42, %v804_v41  ;;  %v808_v47 = vld [vmem:[#allocation10 + $0xe8] sm:$0xff]  ;;  %v803_v48 = vld [vmem:[#allocation10 + $0xc0] sm:$0xff]  ;;  %v806_v49 = vld [vmem:[#allocation10 + $0xd8] sm:$0xff] }
 0x104   : > { %v810_v50 = vld [vmem:[#allocation10 + $0xf8] sm:$0xff]  ;;  %v813_v51 = vld [vmem:[#allocation10 + $0x110] sm:$0xff]  ;;  %v811_v52 = vld [vmem:[#allocation10 + $0x100] sm:$0xff]  ;;  %v2638_v53 = vpack.c.bf16 %v808_v47, %v805_v45  ;;  %v2611_v54 = vpack.c.bf16 %v806_v49, %v803_v48  ;;  %s3859_s26 = scalar_lea.hbm %s3985_s2, %s2244_s25 }
 0x105   : > { %2633 = vmatpush3.bf16.msra.mxu1 %v2632_v34  ;;  %v3711_v55 = vld [vmem:[%s3682_s20] sm:$0xff]  ;;  %v3714_v56 = vld [vmem:[%s3682_s20 + $0x8] sm:$0xff]  ;;  %v2613_v58 = vpack.c.bf16 %v813_v51, %v810_v50  ;;  %s768_s20 = scalar_lea.vmem [#allocation19], %s3678_s21 }
 0x106   : > { %2604 = vmatpush1.bf16.msra.mxu0 %v2603_v35  ;;  %2634 = vmatprep.subr.bf16.mxu1 %v3279_v4  ;;  %v2233_v57 = vld [vmem:[#allocation3] ss:$0 sm:$0xff]  ;;  %v809_v60 = vld [vmem:[#allocation10 + $0xf0] sm:$0xff]  ;;  %v812_v61 = vld [vmem:[#allocation10 + $0x108] sm:$0xff]  ;;  %774 = vst [vmem:[#allocation2 + $0x1] sm:$0xff] %v3711_v55  ;;  %s2088_s11 = sshll.u32 %s768_s20, 4  ;;  %s3861_s11 = int_to_ptr.vmem [resolvable:$true] %s2088_s11 }
 0x107   : > { %2606 = vmatprep.subr.bf16.mxu0 %v2605_v37  ;;  %v814_v59 = vld [vmem:[#allocation10 + $0x118] sm:$0xff]  ;;  %775 = vst [vmem:[#allocation2 + $0x9] sm:$0xff] %v3714_v56  ;;  %v816_v62 = vld [vmem:[#allocation10 + $0x128] sm:$0xff]  ;;  %v819_v63 = vld [vmem:[#allocation10 + $0x140] sm:$0xff]  ;;  %1042 = vperm.xlu0 %2988, %v2233_v57   ;;  %v2615_v2 = vpack.c.bf16 %v812_v61, %v809_v60  ;;  %s3188_s27 = scalar_lea.vmem %s3861_s11, 16  ;;  %p3195_p11 = scmp.lt.s32.totalorder %s3861_s11, %s3193_s9 }
 0x108   : > { %v2236_v0 = vld [vmem:[#allocation4] ss:$0 sm:$0xff]  ;;  %v2641_v1 = vpack.c.bf16 %v814_v59, %v811_v52  ;;  %v817_v3 = vld [vmem:[#allocation10 + $0x130] sm:$0xff]  ;;  %v2617_v6 = vpack.c.bf16 %v819_v63, %v816_v62  ;;  %v820_v7 = vld [vmem:[#allocation10 + $0x148] sm:$0xff]  ;;  %p3189_p6 = scmp.ne.s32.totalorder %s3861_s11, %s3188_s27 }
 0x109   : > { %2636 = vmatpush3.bf16.msra.mxu1 %v2635_v43  ;;  %v815_v8 = vld [vmem:[#allocation10 + $0x120] sm:$0xff]  ;;  %v818_v9 = vld [vmem:[#allocation10 + $0x138] sm:$0xff]  ;;  %v825_v11 = vld [vmem:[#allocation10 + $0x170] sm:$0xff]  ;;  %v2644_v13 = vpack.c.bf16 %v820_v7, %v817_v3 }
 0x10a   : > { %2608 = vmatpush1.bf16.msra.mxu0 %v2607_v44  ;;  %2637 = vmatprep.subr.bf16.mxu1 %v3279_v4  ;;  %v822_v10 = vld [vmem:[#allocation10 + $0x158] sm:$0xff]  ;;  %v823_v12 = vld [vmem:[#allocation10 + $0x160] sm:$0xff]  ;;  %v2619_v14 = vpack.c.bf16 %v818_v9, %v815_v8  ;;  %v821_v20 = vld [vmem:[#allocation10 + $0x150] sm:$0xff]  ;;  %p3190_p10 = pnand %p3189_p6, %p3986_p5 }
 0x10b   : > { %2610 = vmatprep.subr.bf16.mxu0 %v2609_v46  ;;  %1318 = vperm.xlu0 %2988, %v2236_v0   ;;  %v2621_v18 = vpack.c.bf16 %v825_v11, %v822_v10  ;;  %v826_v19 = vld [vmem:[#allocation10 + $0x178] sm:$0xff]  ;;  %v824_v21 = vld [vmem:[#allocation10 + $0x168] sm:$0xff]  ;;  %v1061_v23 = vld [vmem:[#allocation12 + $0x20] sm:$0xff] }
 0x10c   : > { %v1058_v22 = vld [vmem:[#allocation12 + $0x8] sm:$0xff]  ;;  %v2647_v24 = vpack.c.bf16 %v826_v19, %v823_v12  ;;  %v2623_v25 = vpack.c.bf16 %v824_v21, %v821_v20  ;;  %v1057_v27 = vld [vmem:[#allocation12] sm:$0xff]  ;;  %v1060_v28 = vld [vmem:[#allocation12 + $0x18] sm:$0xff]  ;;  %p3191_p1 = pneg %p3190_p10 }
 0x10d   : > { %2639 = vmatpush3.bf16.msra.mxu1 %v2638_v53  ;;  %v776_v15 = vld [vmem:[#allocation2] sm:$0xff]  ;;  %v2649_v26 = vpack.c.bf16 %v1061_v23, %v1058_v22  ;;  %v1059_v29 = vld [vmem:[#allocation12 + $0x10] sm:$0xff]  ;;  %v1064_v31 = vld [vmem:[#allocation12 + $0x38] sm:$0xff]  ;;  %v2651_v33 = vpack.c.bf16 %v1060_v28, %v1057_v27 }
 0x10e   : > { %2612 = vmatpush1.bf16.msra.mxu0 %v2611_v54  ;;  %2640 = vmatprep.subr.bf16.mxu1 %v3279_v4  ;;  %v777_v16 = vld [vmem:[#allocation2 + $0x8] sm:$0xff]  ;;  %v778_v17 = vld [vmem:[#allocation2 + $0x10] sm:$0x3]  ;;  %1049 = vst [vmem:[#allocation2] sm:$0xff] %v3281_v5  ;;  %v1065_v39 = vld [vmem:[#allocation12 + $0x40] sm:$0xff] }
 0x10f   : > { %2614 = vmatprep.subr.bf16.mxu0 %v2613_v58  ;;  %1050 = vst [vmem:[#allocation2 + $0x8] sm:$0xff] %v3281_v5  ;;  %1051 = vst [vmem:[#allocation2 + $0x10] sm:$0xf] %v3281_v5  ;;  %v1062_v30 = vld [vmem:[#allocation12 + $0x28] sm:$0xff]  ;;  %v1067_v32 = vld [vmem:[#allocation12 + $0x50] sm:$0xff] }
 0x110   : > { %v2682_v34 = vpack.c.bf16 %v1062_v30, %v1059_v29  ;;  %v2653_v35 = vpack.c.bf16 %v1067_v32, %v1064_v31  ;;  %v1063_v36 = vld [vmem:[#allocation12 + $0x30] sm:$0xff]  ;;  %v1066_v37 = vld [vmem:[#allocation12 + $0x48] sm:$0xff]  ;;  %v1068_v40 = vld [vmem:[#allocation12 + $0x58] sm:$0xff] }
 0x111   : > { %2642 = vmatpush3.bf16.msra.mxu1 %v2641_v1  ;;  %v2655_v38 = vpack.c.bf16 %v1066_v37, %v1063_v36  ;;  %v2685_v41 = vpack.c.bf16 %v1068_v40, %v1065_v39  ;;  %v1070_v42 = vld [vmem:[#allocation12 + $0x68] sm:$0xff]  ;;  %v1073_v43 = vld [vmem:[#allocation12 + $0x80] sm:$0xff]  ;;  %v1072_v46 = vld [vmem:[#allocation12 + $0x78] sm:$0xff] }
 0x112   : > { %2616 = vmatpush1.bf16.msra.mxu0 %v2615_v2  ;;  %2643 = vmatprep.subr.bf16.mxu1 %v3279_v4  ;;  %v2657_v44 = vpack.c.bf16 %v1073_v43, %v1070_v42  ;;  %v1069_v45 = vld [vmem:[#allocation12 + $0x60] sm:$0xff]  ;;  %v1071_v48 = vld [vmem:[#allocation12 + $0x70] sm:$0xff]  ;;  %v1074_v49 = vld [vmem:[#allocation12 + $0x88] sm:$0xff] }
 0x113   : > { %2618 = vmatprep.subr.bf16.mxu0 %v2617_v6  ;;  %v2659_v47 = vpack.c.bf16 %v1072_v46, %v1069_v45  ;;  %v2688_v50 = vpack.c.bf16 %v1074_v49, %v1071_v48  ;;  %v1076_v51 = vld [vmem:[#allocation12 + $0x98] sm:$0xff]  ;;  %v1079_v52 = vld [vmem:[#allocation12 + $0xb0] sm:$0xff]  ;;  %v1078_v57 = vld [vmem:[#allocation12 + $0xa8] sm:$0xff] }
 0x114   : > { %v2661_v53 = vpack.c.bf16 %v1079_v52, %v1076_v51  ;;  %v1075_v54 = vld [vmem:[#allocation12 + $0x90] sm:$0xff]  ;;  %v1077_v59 = vld [vmem:[#allocation12 + $0xa0] sm:$0xff]  ;;  %v1080_v60 = vld [vmem:[#allocation12 + $0xb8] sm:$0xff] }
 0x115   : > { %2645 = vmatpush3.bf16.msra.mxu1 %v2644_v13  ;;  %v2663_v58 = vpack.c.bf16 %v1078_v57, %v1075_v54  ;;  %v2691_v61 = vpack.c.bf16 %v1080_v60, %v1077_v59  ;;  %v1082_v62 = vld [vmem:[#allocation12 + $0xc8] sm:$0xff]  ;;  %v1085_v63 = vld [vmem:[#allocation12 + $0xe0] sm:$0xff]  ;;  %v1084_v2 = vld [vmem:[#allocation12 + $0xd8] sm:$0xff] }
 0x116   : > { %2620 = vmatpush1.bf16.msra.mxu0 %v2619_v14  ;;  %2646 = vmatprep.subr.bf16.mxu1 %v3279_v4  ;;  %v2665_v0 = vpack.c.bf16 %v1085_v63, %v1082_v62  ;;  %v1081_v1 = vld [vmem:[#allocation12 + $0xc0] sm:$0xff]  ;;  %v1083_v6 = vld [vmem:[#allocation12 + $0xd0] sm:$0xff]  ;;  %v1086_v7 = vld [vmem:[#allocation12 + $0xe8] sm:$0xff] }
 0x117   : > { %2622 = vmatprep.subr.bf16.mxu0 %v2621_v18  ;;  %v2667_v3 = vpack.c.bf16 %v1084_v2, %v1081_v1  ;;  %v2694_v8 = vpack.c.bf16 %v1086_v7, %v1083_v6  ;;  %v1088_v9 = vld [vmem:[#allocation12 + $0xf8] sm:$0xff]  ;;  %v1091_v10 = vld [vmem:[#allocation12 + $0x110] sm:$0xff]  ;;  %v1090_v13 = vld [vmem:[#allocation12 + $0x108] sm:$0xff] }
 0x118   : > { %v2669_v11 = vpack.c.bf16 %v1091_v10, %v1088_v9  ;;  %v1087_v12 = vld [vmem:[#allocation12 + $0xf0] sm:$0xff]  ;;  %v1094_v18 = vld [vmem:[#allocation12 + $0x128] sm:$0xff]  ;;  %v1097_v19 = vld [vmem:[#allocation12 + $0x140] sm:$0xff] }
 0x119   : > { %2648 = vmatpush3.bf16.msra.mxu1 %v2647_v24  ;;  %v2671_v14 = vpack.c.bf16 %v1090_v13, %v1087_v12  ;;  %v2673_v20 = vpack.c.bf16 %v1097_v19, %v1094_v18  ;;  %v1093_v21 = vld [vmem:[#allocation12 + $0x120] sm:$0xff]  ;;  %v1096_v22 = vld [vmem:[#allocation12 + $0x138] sm:$0xff]  ;;  %v1095_v24 = vld [vmem:[#allocation12 + $0x130] sm:$0xff] }
 0x11a   : > { %2624 = vmatpush1.bf16.msra.mxu0 %v2623_v25  ;;  %2681 = vmatprep.subr.bf16.mxu1 %v3279_v4  ;;  %v2675_v23 = vpack.c.bf16 %v1096_v22, %v1093_v21  ;;  %v1098_v25 = vld [vmem:[#allocation12 + $0x148] sm:$0xff]  ;;  %v1100_v27 = vld [vmem:[#allocation12 + $0x158] sm:$0xff]  ;;  %v1103_v28 = vld [vmem:[#allocation12 + $0x170] sm:$0xff] }
 0x11b   : > { %2650 = vmatprep.subr.bf16.mxu0 %v2649_v26  ;;  %v2700_v26 = vpack.c.bf16 %v1098_v25, %v1095_v24  ;;  %v2677_v29 = vpack.c.bf16 %v1103_v28, %v1100_v27  ;;  %v1099_v30 = vld [vmem:[#allocation12 + $0x150] sm:$0xff]  ;;  %v1102_v31 = vld [vmem:[#allocation12 + $0x168] sm:$0xff]  ;;  %v1325_v36 = vld [vmem:[#allocation13] sm:$0xff] }
 0x11c   : > { %2392 = vmatmul.mubr.f32.vlgmr.msra.gmra.mrb[0].mxu1 %v776_v15  ;;  %v2679_v32 = vpack.c.bf16 %v1102_v31, %v1099_v30  ;;  %v1326_v37 = vld [vmem:[#allocation13 + $0x8] sm:$0xff]  ;;  %v2231_v62 = vld [vmem:[%s3979_s1] ss:$0 sm:$0xff]  ;;  %v1335_v31 = vld [vmem:[#allocation13 + $0x50] sm:$0xff]  ;;  %s3981_s1 = sld [smem:[#allocation33_spill]] }
 0x11d   : > { %892 = vmatmul.mubr.f32.vlgmr.msra.gmra.mrb[0].mxu0 %v776_v15  ;;  %2394 = vmatprep.mubr.msk.f32.mxu1 %vm3280_vm0, %v3281_v5  ;;  %v1089_v15 = vld [vmem:[#allocation12 + $0x100] sm:$0xff]  ;;  %v1330_v21 = vld [vmem:[#allocation13 + $0x28] sm:$0xff] }
 0x11e   : > { %897 = vmatprep.mubr.f32.mxu0 %v3281_v5  ;;  %2652 = vmatpush1.bf16.msra.mxu0 %v2651_v33  ;;  %v1101_v33 = vld [vmem:[#allocation12 + $0x160] sm:$0xff] }
 0x11f   : > { %2683 = vmatpush3.bf16.msra.mxu1 %v2682_v34  ;;  %2654 = vmatprep.subr.bf16.mxu0 %v2653_v35  ;;  %v1104_v34 = vld [vmem:[#allocation12 + $0x178] sm:$0xff]  ;;  %v2232_v2 = vld [vmem:[%s3980_s29] ss:$0 sm:$0xff]  ;;  %s3982_s29 = sld [smem:[#allocation35_spill]] }
 0x120   : > { %2684 = vmatprep.subr.bf16.mxu1 %v3279_v4  ;;  %2395 = vmatmul.mubr.f32.gmra.mrb[2].mxu1 %v777_v16  ;;  %v2703_v35 = vpack.c.bf16 %v1104_v34, %v1101_v33  ;;  %v1333_v28 = vld [vmem:[#allocation13 + $0x40] sm:$0xff] }
 0x121   : > { %898 = vmatmul.mubr.f32.gmra.mrb[2].mxu0 %v777_v16  ;;  %2397 = vmatprep.mubr.msk.f32.mxu1 %vm3280_vm0, %v3281_v5  ;;  %v1092_v16 = vld [vmem:[#allocation12 + $0x118] sm:$0xff]  ;;  %v1337_v34 = vld [vmem:[#allocation13 + $0x60] sm:$0xff] }
 0x122   : > { %903 = vmatprep.mubr.f32.mxu0 %v3281_v5  ;;  %2656 = vmatpush1.bf16.msra.mxu0 %v2655_v38  ;;  %v2705_v38 = vpack.c.bf16 %v1326_v37, %v1325_v36  ;;  %v1339_v37 = vld [vmem:[#allocation13 + $0x70] sm:$0xff] }
 0x123   : > { %2686 = vmatpush3.bf16.msra.mxu1 %v2685_v41  ;;  %2658 = vmatprep.subr.bf16.mxu0 %v2657_v44 }
 0x124   : > { %2398 = vmatmul.mubr.f32.gmra.mrb[4].mxu1 %v778_v17  ;;  %2687 = vmatprep.subr.bf16.mxu1 %v3279_v4 }
 0x125   : > { %904 = vmatmul.mubr.f32.gmra.mrb[4].mxu0 %v778_v17  ;;  %2432 = vmatprep.mubr.msk.f32.mxu1 %vm3280_vm0, %v3281_v5  ;;  %v2697_v17 = vpack.c.bf16 %v1092_v16, %v1089_v15  ;;  %v1327_v16 = vld [vmem:[#allocation13 + $0x10] sm:$0xff] }
 0x126   : > { %1169 = vmatprep.mubr.f32.mxu0 %v3281_v5  ;;  %2660 = vmatpush1.bf16.msra.mxu0 %v2659_v47 }
 0x127   : > { %2689 = vmatpush3.bf16.msra.mxu1 %v2688_v50  ;;  %2662 = vmatprep.subr.bf16.mxu0 %v2661_v53 }
 0x128   : > { %2690 = vmatprep.subr.bf16.mxu1 %v3279_v4 }
 0x12a   : > { %2664 = vmatpush1.bf16.msra.mxu0 %v2663_v58 }
 0x12b   : > { %2692 = vmatpush3.bf16.msra.mxu1 %v2691_v61  ;;  %2666 = vmatprep.subr.bf16.mxu0 %v2665_v0 }
 0x12c   : > { %2693 = vmatprep.subr.bf16.mxu1 %v3279_v4 }
 0x12e   : > { %2668 = vmatpush1.bf16.msra.mxu0 %v2667_v3 }
 0x12f   : > { %2695 = vmatpush3.bf16.msra.mxu1 %v2694_v8  ;;  %2670 = vmatprep.subr.bf16.mxu0 %v2669_v11 }
 0x130   : > { %2696 = vmatprep.subr.bf16.mxu1 %v3279_v4 }
 0x132   : > { %2672 = vmatpush1.bf16.msra.mxu0 %v2671_v14 }
 0x133   : > { %2698 = vmatpush3.bf16.msra.mxu1 %v2697_v17  ;;  %2674 = vmatprep.subr.bf16.mxu0 %v2673_v20  ;;  %v1328_v17 = vld [vmem:[#allocation13 + $0x18] sm:$0xff]  ;;  %v1329_v20 = vld [vmem:[#allocation13 + $0x20] sm:$0xff] }
 0x134   : > { %2699 = vmatprep.subr.bf16.mxu1 %v3279_v4  ;;  %v2709_v18 = vpack.c.bf16 %v1328_v17, %v1327_v16  ;;  %v2713_v22 = vpack.c.bf16 %v1330_v21, %v1329_v20  ;;  %v1457_v17 = vld [vmem:[#allocation15 + $0xc0] sm:$0xff]  ;;  %v1462_v20 = vld [vmem:[#allocation15 + $0xe8] sm:$0xff] }
 0x136   : > { %2676 = vmatpush1.bf16.msra.mxu0 %v2675_v23  ;;  %v1331_v23 = vld [vmem:[#allocation13 + $0x30] sm:$0xff] }
 0x137   : > { %2701 = vmatpush3.bf16.msra.mxu1 %v2700_v26  ;;  %2678 = vmatprep.subr.bf16.mxu0 %v2677_v29  ;;  %v1332_v26 = vld [vmem:[#allocation13 + $0x38] sm:$0xff]  ;;  %v1334_v29 = vld [vmem:[#allocation13 + $0x48] sm:$0xff] }
 0x138   : > { %2702 = vmatprep.subr.bf16.mxu1 %v3279_v4  ;;  %v2717_v27 = vpack.c.bf16 %v1332_v26, %v1331_v23  ;;  %v2721_v30 = vpack.c.bf16 %v1334_v29, %v1333_v28  ;;  %v1464_v23 = vld [vmem:[#allocation15 + $0xf8] sm:$0xff]  ;;  %v1463_v26 = vld [vmem:[#allocation15 + $0xf0] sm:$0xff]  ;;  %v1465_v29 = vld [vmem:[#allocation15 + $0x100] sm:$0xff] }
 0x13a   : > { %2680 = vmatpush1.bf16.msra.mxu0 %v2679_v32  ;;  %v1336_v32 = vld [vmem:[#allocation13 + $0x58] sm:$0xff] }
 0x13b   : > { %2704 = vmatpush3.bf16.msra.mxu1 %v2703_v35  ;;  %2706 = vmatprep.subr.bf16.mxu0 %v2705_v38  ;;  %v2725_v33 = vpack.c.bf16 %v1336_v32, %v1335_v31  ;;  %v1338_v35 = vld [vmem:[#allocation13 + $0x68] sm:$0xff] }
 0x13c   : > { %v2729_v36 = vpack.c.bf16 %v1338_v35, %v1337_v34  ;;  %v1470_v32 = vld [vmem:[#allocation15 + $0x128] sm:$0xff]  ;;  %v1469_v35 = vld [vmem:[#allocation15 + $0x120] sm:$0xff] }
 0x186   : > { %v1043_v9 = vpop.permute.xlu0 %1042 }
 0x1ef   : > { %v975_v40 = vpop.f32.mrb[0].mxu1 }
 0x1f0   : > { %v893_v39 = vpop.f32.mrb[0].mxu0  ;;  %v2393_v42 = vpop.f32.mrb[1].mxu1  ;;  %v1006_v43 = vrot.slane %v975_v40, 2  ;;  %v1437_v40 = vld [vmem:[#allocation15 + $0x20] sm:$0xff] }
 0x1f1   : > { %v895_v41 = vpop.f32.mrb[1].mxu0  ;;  %v1433_v42 = vld [vmem:[#allocation15] sm:$0xff] }
 0x1f2   : > { %v993_v49 = vrot.slane %v895_v41, 1 }
 0x1f3   : > { %v980_v44 = vpop.f32.mrb[2].mxu1 }
 0x1f4   : > { %v899_v45 = vpop.f32.mrb[2].mxu0  ;;  %v1007_v46 = vrot.slane %v980_v44, 2  ;;  %v2396_v48 = vpop.f32.mrb[3].mxu1  ;;  %v1435_v44 = vld [vmem:[#allocation15 + $0x10] sm:$0xff] }
 0x1f5   : > { %v901_v47 = vpop.f32.mrb[3].mxu0  ;;  %v1440_v48 = vld [vmem:[#allocation15 + $0x38] sm:$0xff] }
 0x1f6   : > { %v994_v50 = vrot.slane %v901_v47, 1  ;;  %v1008_v51 = vsel %vm1005_vm1, %v1006_v43, %v1007_v46  ;;  %v1436_v43 = vld [vmem:[#allocation15 + $0x18] sm:$0xff] }
 0x1f7   : > { %v985_v53 = vpop.f32.mrb[4].mxu1 }
 0x1f8   : > { %v995_v52 = vsel %vm992_vm2, %v993_v49, %v994_v50  ;;  %v905_v54 = vpop.f32.mrb[4].mxu0  ;;  %v1009_v58 = vrot.slane %v985_v53, 2  ;;  %v2399_v60 = vpop.f32.mrb[5].mxu1  ;;  %v1443_v49 = vld [vmem:[#allocation15 + $0x50] sm:$0xff]  ;;  %v1444_v53 = vld [vmem:[#allocation15 + $0x58] sm:$0xff] }
 0x1f9   : > { %v1000_v57 = vadd.f32 %v995_v52, %v893_v39  ;;  %v906_v59 = vpop.f32.mrb[5].mxu0  ;;  %v1441_v52 = vld [vmem:[#allocation15 + $0x40] sm:$0xff] }
 0x1fa   : > { %v996_v61 = vrot.slane %v906_v59, 1  ;;  %v1010_v0 = vsel %vm1005_vm1, %v1007_v46, %v1009_v58  ;;  %v1438_v46 = vld [vmem:[#allocation15 + $0x28] sm:$0xff]  ;;  %v1449_v59 = vld [vmem:[#allocation15 + $0x80] sm:$0xff] }
 0x1fb   : > { %v1013_v63 = vadd.f32 %v1008_v51, %v1000_v57  ;;  %v2770_v47 = vpack.c.bf16 %v1438_v46, %v1435_v44  ;;  %v2741_v51 = vpack.c.bf16 %v1443_v49, %v1440_v48  ;;  %v2773_v57 = vpack.c.bf16 %v1444_v53, %v1441_v52  ;;  %v1446_v58 = vld [vmem:[#allocation15 + $0x68] sm:$0xff]  ;;  %v1445_v60 = vld [vmem:[#allocation15 + $0x60] sm:$0xff]  ;;  %v1480_v46 = vld [vmem:[#allocation15 + $0x178] sm:$0xff] }
 0x1fc   : > { %v997_v1 = vsel %vm992_vm2, %v994_v50, %v996_v61  ;;  %v1439_v50 = vld [vmem:[#allocation15 + $0x30] sm:$0xff]  ;;  %v2745_v61 = vpack.c.bf16 %v1449_v59, %v1446_v58  ;;  %v1478_v44 = vld [vmem:[#allocation15 + $0x168] sm:$0xff]  ;;  %v2240_v49 = vld [vmem:[#allocation5] ss:$0 sm:$0xff] }
 0x1fd   : > { %v1001_v3 = vadd.f32 %v997_v1, %v899_v45  ;;  %v1022_v6 = vmul.f32 %v2231_v62, %v1013_v63  ;;  %v2739_v45 = vpack.c.bf16 %v1436_v43, %v1433_v42  ;;  %v1447_v63 = vld [vmem:[#allocation15 + $0x70] sm:$0xff]  ;;  %1695 = vperm.xlu1 %2989, %v2240_v49   ;;  %v1719_v49 = vld [vmem:[#allocation16 + $0x48] sm:$0xff] }
 0x1fe   : > { %v1475_v42 = vld [vmem:[#allocation15 + $0x150] sm:$0xff] }
 0x1ff   : > { %v1014_v7 = vadd.f32 %v1010_v0, %v1001_v3  ;;  %v1031_v8 = vadd.f32 %v2232_v2, %v1022_v6  ;;  %v1450_v0 = vld [vmem:[#allocation15 + $0x88] sm:$0xff]  ;;  %v1455_v3 = vld [vmem:[#allocation15 + $0xb0] sm:$0xff] }
 0x200   : > { %v2776_v6 = vpack.c.bf16 %v1450_v0, %v1447_v63 }
 0x201   : > { %v1023_v10 = vmul.f32 %v2231_v62, %v1014_v7  ;;  %vm1033_vm3 = vcmp.ge.f32.partialorder %v1031_v8, 0.0  ;;  %v1045_v11 = vmul.f32 %v1043_v9, %v1031_v8  ;;  %v1448_v62 = vld [vmem:[#allocation15 + $0x78] sm:$0xff] }
 0x202   : > { %v2747_v1 = vpack.c.bf16 %v1448_v62, %v1445_v60 }
 0x203   : > { %v1032_v12 = vadd.f32 %v2232_v2, %v1023_v10  ;;  %v1047_v13 = vsel %vm1033_vm3, %v1031_v8, %v1045_v11  ;;  %v1452_v2 = vld [vmem:[#allocation15 + $0x98] sm:$0xff]  ;;  %v1451_v8 = vld [vmem:[#allocation15 + $0x90] sm:$0xff]  ;;  %v1453_v10 = vld [vmem:[#allocation15 + $0xa0] sm:$0xff] }
 0x204   : > { %1052 = vst [vmem:[#allocation2 + $0x1] sm:$0xff] %v1047_v13  ;;  %v2749_v7 = vpack.c.bf16 %v1455_v3, %v1452_v2  ;;  %v1456_v11 = vld [vmem:[#allocation15 + $0xb8] sm:$0xff]  ;;  %v1461_v13 = vld [vmem:[#allocation15 + $0xe0] sm:$0xff] }
 0x205   : > { %vm1034_vm4 = vcmp.ge.f32.partialorder %v1032_v12, 0.0  ;;  %v1046_v14 = vmul.f32 %v1043_v9, %v1032_v12  ;;  %v1454_v9 = vld [vmem:[#allocation15 + $0xa8] sm:$0xff] }
 0x207   : > { %v1048_v15 = vsel %vm1034_vm4, %v1032_v12, %v1046_v14  ;;  %v1458_v12 = vld [vmem:[#allocation15 + $0xc8] sm:$0xff]  ;;  %v2751_v14 = vpack.c.bf16 %v1454_v9, %v1451_v8 }
 0x208   : > { %1053 = vst [vmem:[#allocation2 + $0x9] sm:$0xff] %v1048_v15  ;;  %v2779_v15 = vpack.c.bf16 %v1456_v11, %v1453_v10  ;;  %v2753_v16 = vpack.c.bf16 %v1461_v13, %v1458_v12 }
 0x20b   : > { %v1054_v19 = vld [vmem:[#allocation2] sm:$0xff] }
 0x20c   : > { %1170 = vmatmul.mubr.f32.vlgmr.msra.gmra.mrb[6].mxu0 %v1054_v19  ;;  %1425 = vst [vmem:[#allocation2] sm:$0xff] %v3281_v5  ;;  %2433 = vmatmul.mubr.f32.vlgmr.msra.gmra.mrb[6].mxu1 %v1054_v19  ;;  %v1459_v19 = vld [vmem:[#allocation15 + $0xd0] sm:$0xff] }
 0x20d   : > { %2708 = vmatpush3.bf16.msra.mxu0 %v2705_v38  ;;  %1175 = vmatprep.mubr.f32.mxu0 %v3281_v5  ;;  %v1340_v38 = vld [vmem:[#allocation13 + $0x78] sm:$0xff] }
 0x20e   : > { %2435 = vmatprep.mubr.msk.f32.mxu1 %vm3280_vm0, %v3281_v5  ;;  %2710 = vmatprep.subr.bf16.mxu0 %v2709_v18  ;;  %v2733_v39 = vpack.c.bf16 %v1340_v38, %v1339_v37  ;;  %v1471_v37 = vld [vmem:[#allocation15 + $0x130] sm:$0xff] }
 0x20f   : > { %v1055_v24 = vld [vmem:[#allocation2 + $0x8] sm:$0xff]  ;;  %v1056_v25 = vld [vmem:[#allocation2 + $0x10] sm:$0x3] }
 0x210   : > { %1176 = vmatmul.mubr.f32.gmra.mrb[8].mxu0 %v1055_v24  ;;  %1426 = vst [vmem:[#allocation2 + $0x8] sm:$0xff] %v3281_v5  ;;  %2436 = vmatmul.mubr.f32.gmra.mrb[8].mxu1 %v1055_v24  ;;  %1427 = vst [vmem:[#allocation2 + $0x10] sm:$0xf] %v3281_v5  ;;  %v1467_v24 = vld [vmem:[#allocation15 + $0x110] sm:$0xff] }
 0x211   : > { %2712 = vmatpush3.bf16.msra.mxu0 %v2709_v18  ;;  %1181 = vmatprep.mubr.f32.mxu0 %v3281_v5  ;;  %v1460_v18 = vld [vmem:[#allocation15 + $0xd8] sm:$0xff] }
 0x212   : > { %2438 = vmatprep.mubr.msk.f32.mxu1 %vm3280_vm0, %v3281_v5  ;;  %2714 = vmatprep.subr.bf16.mxu0 %v2713_v22  ;;  %v2755_v21 = vpack.c.bf16 %v1460_v18, %v1457_v17 }
 0x214   : > { %1182 = vmatmul.mubr.f32.gmra.mrb[10].mxu0 %v1056_v25  ;;  %2439 = vmatmul.mubr.f32.gmra.mrb[10].mxu1 %v1056_v25  ;;  %v2757_v25 = vpack.c.bf16 %v1467_v24, %v1464_v23 }
 0x215   : > { %2716 = vmatpush3.bf16.msra.mxu0 %v2713_v22  ;;  %2473 = vmatprep.mubr.f32.mxu0 %v3711_v55  ;;  %v1434_v55 = vld [vmem:[#allocation15 + $0x8] sm:$0xff]  ;;  %v2782_v22 = vpack.c.bf16 %v1462_v20, %v1459_v19  ;;  %v2234_v19 = vld [vmem:[%s3909_s6] ss:$0 sm:$0xff] }
 0x216   : > { %2718 = vmatprep.subr.bf16.mxu0 %v2717_v27  ;;  %1545 = vmatprep.mubr.f32.mxu1 %v3281_v5  ;;  %v2737_v41 = vpack.c.bf16 %v1437_v40, %v1434_v55  ;;  %v1476_v40 = vld [vmem:[#allocation15 + $0x158] sm:$0xff] }
 0x218   : > { %2738 = vmatprep.subr.bf16.mxu1 %v2737_v41  ;;  %v1479_v41 = vld [vmem:[#allocation15 + $0x170] sm:$0xff] }
 0x219   : > { %2720 = vmatpush3.bf16.msra.mxu0 %v2717_v27  ;;  %2740 = vmatpush1.bf16.msra.mxu1 %v2739_v45  ;;  %v1466_v27 = vld [vmem:[#allocation15 + $0x108] sm:$0xff]  ;;  %v2765_v43 = vpack.c.bf16 %v1479_v41, %v1476_v40  ;;  %v1477_v45 = vld [vmem:[#allocation15 + $0x160] sm:$0xff] }
 0x21a   : > { %2722 = vmatprep.subr.bf16.mxu0 %v2721_v30  ;;  %2742 = vmatprep.subr.bf16.mxu1 %v2741_v51  ;;  %v2759_v28 = vpack.c.bf16 %v1466_v27, %v1463_v26  ;;  %v2791_v48 = vpack.c.bf16 %v1480_v46, %v1477_v45  ;;  %v1714_v51 = vld [vmem:[#allocation16 + $0x20] sm:$0xff]  ;;  %v1717_v45 = vld [vmem:[#allocation16 + $0x38] sm:$0xff]  ;;  %v1720_v46 = vld [vmem:[#allocation16 + $0x50] sm:$0xff] }
 0x21b   : > { %v2237_v27 = vld [vmem:[%s3912_s10] ss:$0 sm:$0xff] }
 0x21d   : > { %2724 = vmatpush3.bf16.msra.mxu0 %v2721_v30  ;;  %v1468_v30 = vld [vmem:[#allocation15 + $0x118] sm:$0xff] }
 0x21e   : > { %2726 = vmatprep.subr.bf16.mxu0 %v2725_v33  ;;  %v2785_v31 = vpack.c.bf16 %v1468_v30, %v1465_v29 }
 0x221   : > { %2728 = vmatpush3.bf16.msra.mxu0 %v2725_v33  ;;  %v1473_v33 = vld [vmem:[#allocation15 + $0x140] sm:$0xff] }
 0x222   : > { %2730 = vmatprep.subr.bf16.mxu0 %v2729_v36  ;;  %v2761_v34 = vpack.c.bf16 %v1473_v33, %v1470_v32 }
 0x225   : > { %2732 = vmatpush3.bf16.msra.mxu0 %v2729_v36  ;;  %v1472_v36 = vld [vmem:[#allocation15 + $0x138] sm:$0xff] }
 0x226   : > { %2734 = vmatprep.subr.bf16.mxu0 %v2733_v39  ;;  %v2763_v38 = vpack.c.bf16 %v1472_v36, %v1469_v35 }
 0x229   : > { %2736 = vmatpush3.bf16.msra.mxu0 %v2733_v39  ;;  %v1474_v39 = vld [vmem:[#allocation15 + $0x148] sm:$0xff] }
 0x22a   : > { %2769 = vmatprep.subr.bf16.mxu0 %v3279_v4  ;;  %v2788_v55 = vpack.c.bf16 %v1474_v39, %v1471_v37  ;;  %v1710_v37 = vld [vmem:[#allocation16] sm:$0xff]  ;;  %v1712_v39 = vld [vmem:[#allocation16 + $0x10] sm:$0xff] }
 0x22c   : > { %2474 = vmatmul.mubr.f32.vlgmr.msra.gmra.mrb[12].mxu0 %v3714_v56  ;;  %v1442_v56 = vld [vmem:[#allocation15 + $0x48] sm:$0xff] }
 0x22d   : > { %2508 = vmatprep.mubr.msk.f32.mxu0 %vm3280_vm0, %v3281_v5  ;;  %2771 = vmatpush3.bf16.msra.mxu0 %v2770_v47  ;;  %v2743_v54 = vpack.c.bf16 %v1442_v56, %v1439_v50  ;;  %v2767_v47 = vpack.c.bf16 %v1478_v44, %v1475_v42  ;;  %v1711_v50 = vld [vmem:[#allocation16 + $0x8] sm:$0xff]  ;;  %v2243_v56 = vld [vmem:[#allocation6] ss:$0 sm:$0xff] }
 0x22e   : > { %2772 = vmatprep.subr.bf16.mxu0 %v3279_v4  ;;  %v2793_v52 = vpack.c.bf16 %v1714_v51, %v1711_v50  ;;  %1971 = vperm.xlu1 %2989, %v2243_v56   ;;  %v1718_v50 = vld [vmem:[#allocation16 + $0x40] sm:$0xff]  ;;  %v1721_v56 = vld [vmem:[#allocation16 + $0x58] sm:$0xff] }
 0x22f   : > { %2744 = vmatpush1.bf16.msra.mxu1 %v2743_v54 }
 0x230   : > { %2746 = vmatprep.subr.bf16.mxu1 %v2745_v61 }
 0x231   : > { %2774 = vmatpush3.bf16.msra.mxu0 %v2773_v57 }
 0x232   : > { %2775 = vmatprep.subr.bf16.mxu0 %v3279_v4 }
 0x233   : > { %2748 = vmatpush1.bf16.msra.mxu1 %v2747_v1 }
 0x234   : > { %2750 = vmatprep.subr.bf16.mxu1 %v2749_v7 }
 0x235   : > { %2777 = vmatpush3.bf16.msra.mxu0 %v2776_v6 }
 0x236   : > { %2778 = vmatprep.subr.bf16.mxu0 %v3279_v4 }
 0x237   : > { %2752 = vmatpush1.bf16.msra.mxu1 %v2751_v14 }
 0x238   : > { %2754 = vmatprep.subr.bf16.mxu1 %v2753_v16 }
 0x239   : > { %2780 = vmatpush3.bf16.msra.mxu0 %v2779_v15 }
 0x23a   : > { %2781 = vmatprep.subr.bf16.mxu0 %v3279_v4 }
 0x23b   : > { %2756 = vmatpush1.bf16.msra.mxu1 %v2755_v21 }
 0x23c   : > { %2758 = vmatprep.subr.bf16.mxu1 %v2757_v25  ;;  %v1319_v25 = vpop.permute.xlu0 %1318 }
 0x23d   : > { %2783 = vmatpush3.bf16.msra.mxu0 %v2782_v22  ;;  %v2235_v22 = vld [vmem:[%s3910_s7] ss:$0 sm:$0xff] }
 0x23e   : > { %2784 = vmatprep.subr.bf16.mxu0 %v3279_v4 }
 0x23f   : > { %2760 = vmatpush1.bf16.msra.mxu1 %v2759_v28 }
 0x240   : > { %2762 = vmatprep.subr.bf16.mxu1 %v2761_v34 }
 0x241   : > { %2786 = vmatpush3.bf16.msra.mxu0 %v2785_v31 }
 0x242   : > { %2787 = vmatprep.subr.bf16.mxu0 %v3279_v4 }
 0x243   : > { %2764 = vmatpush1.bf16.msra.mxu1 %v2763_v38  ;;  %v1713_v38 = vld [vmem:[#allocation16 + $0x18] sm:$0xff] }
 0x244   : > { %2766 = vmatprep.subr.bf16.mxu1 %v2765_v43  ;;  %v2795_v41 = vpack.c.bf16 %v1713_v38, %v1710_v37  ;;  %v1751_v38 = vld [vmem:[#allocation16 + $0x148] sm:$0xff] }
 0x245   : > { %2789 = vmatpush3.bf16.msra.mxu0 %v2788_v55  ;;  %v1715_v55 = vld [vmem:[#allocation16 + $0x28] sm:$0xff] }
 0x246   : > { %2790 = vmatprep.subr.bf16.mxu0 %v3279_v4  ;;  %v2826_v42 = vpack.c.bf16 %v1715_v55, %v1712_v39  ;;  %v1753_v55 = vld [vmem:[#allocation16 + $0x158] sm:$0xff] }
 0x247   : > { %2768 = vmatpush1.bf16.msra.mxu1 %v2767_v47  ;;  %v2797_v47 = vpack.c.bf16 %v1720_v46, %v1717_v45  ;;  %v1757_v46 = vld [vmem:[#allocation16 + $0x178] sm:$0xff] }
 0x248   : > { %2794 = vmatprep.subr.bf16.mxu1 %v2793_v52  ;;  %v2829_v52 = vpack.c.bf16 %v1721_v56, %v1718_v50 }
 0x249   : > { %2792 = vmatpush3.bf16.msra.mxu0 %v2791_v48  ;;  %v1716_v48 = vld [vmem:[#allocation16 + $0x30] sm:$0xff] }
 0x24a   : > { %2825 = vmatprep.subr.bf16.mxu0 %v3279_v4  ;;  %v2799_v51 = vpack.c.bf16 %v1719_v49, %v1716_v48 }
 0x2df   : > { %v1171_v53 = vpop.f32.mrb[6].mxu0  ;;  %v1253_v54 = vpop.f32.mrb[6].mxu1 }
 0x2e0   : > { %v1173_v57 = vpop.f32.mrb[7].mxu0  ;;  %v2434_v58 = vpop.f32.mrb[7].mxu1  ;;  %v1282_v61 = vrot.slane %v1253_v54, 2  ;;  %v1726_v54 = vld [vmem:[#allocation16 + $0x80] sm:$0xff] }
 0x2e1   : > { %v1270_v1 = vrot.slane %v1173_v57, 1  ;;  %v1722_v58 = vld [vmem:[#allocation16 + $0x60] sm:$0xff] }
 0x2e3   : > { %v1177_v59 = vpop.f32.mrb[8].mxu0  ;;  %v1258_v60 = vpop.f32.mrb[8].mxu1 }
 0x2e4   : > { %v1283_v62 = vrot.slane %v1258_v60, 2  ;;  %v1179_v63 = vpop.f32.mrb[9].mxu0  ;;  %v2437_v0 = vpop.f32.mrb[9].mxu1  ;;  %v1724_v60 = vld [vmem:[#allocation16 + $0x70] sm:$0xff] }
 0x2e5   : > { %v1271_v2 = vrot.slane %v1179_v63, 1  ;;  %v1729_v0 = vld [vmem:[#allocation16 + $0x98] sm:$0xff] }
 0x2e6   : > { %v1284_v3 = vsel %vm1005_vm1, %v1282_v61, %v1283_v62 }
 0x2e7   : > { %v1272_v6 = vsel %vm992_vm2, %v1270_v1, %v1271_v2  ;;  %v1183_v7 = vpop.f32.mrb[10].mxu0  ;;  %v1263_v8 = vpop.f32.mrb[10].mxu1  ;;  %v1732_v1 = vld [vmem:[#allocation16 + $0xb0] sm:$0xff] }
 0x2e8   : > { %v1277_v9 = vadd.f32 %v1272_v6, %v1171_v53  ;;  %v1285_v10 = vrot.slane %v1263_v8, 2  ;;  %v1184_v11 = vpop.f32.mrb[11].mxu0  ;;  %v2440_v12 = vpop.f32.mrb[11].mxu1  ;;  %v1723_v53 = vld [vmem:[#allocation16 + $0x68] sm:$0xff]  ;;  %v1730_v7 = vld [vmem:[#allocation16 + $0xa0] sm:$0xff] }
 0x2e9   : > { %v1273_v13 = vrot.slane %v1184_v11, 1  ;;  %v2801_v57 = vpack.c.bf16 %v1726_v54, %v1723_v53  ;;  %v1731_v6 = vld [vmem:[#allocation16 + $0xa8] sm:$0xff]  ;;  %v1738_v12 = vld [vmem:[#allocation16 + $0xe0] sm:$0xff] }
 0x2ea   : > { %v1289_v14 = vadd.f32 %v1284_v3, %v1277_v9  ;;  %v1286_v15 = vsel %vm1005_vm1, %v1283_v62, %v1285_v10  ;;  %v1727_v62 = vld [vmem:[#allocation16 + $0x88] sm:$0xff]  ;;  %v1728_v3 = vld [vmem:[#allocation16 + $0x90] sm:$0xff]  ;;  %v1733_v9 = vld [vmem:[#allocation16 + $0xb8] sm:$0xff] }
 0x2eb   : > { %v1274_v16 = vsel %vm992_vm2, %v1271_v2, %v1273_v13  ;;  %v2832_v63 = vpack.c.bf16 %v1727_v62, %v1724_v60  ;;  %v2805_v2 = vpack.c.bf16 %v1732_v1, %v1729_v0  ;;  %v2807_v8 = vpack.c.bf16 %v1731_v6, %v1728_v3  ;;  %v1735_v11 = vld [vmem:[#allocation16 + $0xc8] sm:$0xff] }
 0x2ec   : > { %v1278_v17 = vadd.f32 %v1274_v16, %v1177_v59  ;;  %v1298_v21 = vmul.f32 %v2234_v19, %v1289_v14  ;;  %v1725_v59 = vld [vmem:[#allocation16 + $0x78] sm:$0xff]  ;;  %v2835_v10 = vpack.c.bf16 %v1733_v9, %v1730_v7  ;;  %v2809_v13 = vpack.c.bf16 %v1738_v12, %v1735_v11  ;;  %v1734_v14 = vld [vmem:[#allocation16 + $0xc0] sm:$0xff]  ;;  %v1736_v16 = vld [vmem:[#allocation16 + $0xd0] sm:$0xff] }
 0x2ed   : > { %v2803_v61 = vpack.c.bf16 %v1725_v59, %v1722_v58  ;;  %v2239_v12 = vld [vmem:[%s3981_s1] ss:$0 sm:$0xff] }
 0x2ee   : > { %v1290_v18 = vadd.f32 %v1286_v15, %v1278_v17  ;;  %v1307_v24 = vadd.f32 %v2235_v22, %v1298_v21  ;;  %v1737_v15 = vld [vmem:[#allocation16 + $0xd8] sm:$0xff]  ;;  %v1744_v21 = vld [vmem:[#allocation16 + $0x110] sm:$0xff] }
 0x2ef   : > { %v2811_v17 = vpack.c.bf16 %v1737_v15, %v1734_v14 }
 0x2f0   : > { %v1299_v20 = vmul.f32 %v2234_v19, %v1290_v18  ;;  %v1321_v28 = vmul.f32 %v1319_v25, %v1307_v24  ;;  %vm1309_vm6 = vcmp.ge.f32.partialorder %v1307_v24, 0.0  ;;  %v1739_v18 = vld [vmem:[#allocation16 + $0xe8] sm:$0xff] }
 0x2f1   : > { %v2838_v19 = vpack.c.bf16 %v1739_v18, %v1736_v16 }
 0x2f2   : > { %v1308_v23 = vadd.f32 %v2235_v22, %v1299_v20  ;;  %v1323_v35 = vsel %vm1309_vm6, %v1307_v24, %v1321_v28  ;;  %v1741_v20 = vld [vmem:[#allocation16 + $0xf8] sm:$0xff]  ;;  %v1743_v24 = vld [vmem:[#allocation16 + $0x108] sm:$0xff] }
 0x2f3   : > { %v2813_v22 = vpack.c.bf16 %v1744_v21, %v1741_v20 }
 0x2f4   : > { %v1322_v26 = vmul.f32 %v1319_v25, %v1308_v23  ;;  %vm1310_vm5 = vcmp.ge.f32.partialorder %v1308_v23, 0.0 }
 0x2f6   : > { %v1324_v32 = vsel %vm1310_vm5, %v1308_v23, %v1322_v26  ;;  %v1740_v23 = vld [vmem:[#allocation16 + $0xf0] sm:$0xff]  ;;  %v1742_v26 = vld [vmem:[#allocation16 + $0x100] sm:$0xff] }
 0x2f7   : > { %v2815_v25 = vpack.c.bf16 %v1743_v24, %v1740_v23 }
 0x2ff   : > { %v2475_v29 = vpop.f32.mrb[12].mxu0 }
 0x300   : > { %v1420_v30 = vadd.f32 %v2475_v29, %v2237_v27  ;;  %v1414_v31 = vpop.f32.mrb[13].mxu0  ;;  %v1747_v29 = vld [vmem:[#allocation16 + $0x128] sm:$0xff] }
 0x301   : > { %v1415_v33 = vadd.f32 %v2237_v27, %v1414_v31  ;;  %v1745_v27 = vld [vmem:[#allocation16 + $0x118] sm:$0xff] }
 0x302   : > { %v3788_v34 = vadd.f32 %v1420_v30, %v1324_v32  ;;  %v2841_v28 = vpack.c.bf16 %v1745_v27, %v1742_v26  ;;  %v1750_v30 = vld [vmem:[#allocation16 + $0x140] sm:$0xff] }
 0x303   : > { %v3790_v36 = vadd.f32 %v1415_v33, %v1323_v35  ;;  %v2817_v31 = vpack.c.bf16 %v1750_v30, %v1747_v29  ;;  %v1746_v32 = vld [vmem:[#allocation16 + $0x120] sm:$0xff]  ;;  %v1749_v33 = vld [vmem:[#allocation16 + $0x138] sm:$0xff]  ;;  %v1748_v35 = vld [vmem:[#allocation16 + $0x130] sm:$0xff] }
 0x304   : > { %1429 = vst [vmem:[#allocation2 + $0xa] sm:$0xff] %v3788_v34  ;;  %v2819_v37 = vpack.c.bf16 %v1749_v33, %v1746_v32  ;;  %v2844_v39 = vpack.c.bf16 %v1751_v38, %v1748_v35  ;;  %v1987_v27 = vld [vmem:[#allocation18] sm:$0xff]  ;;  %v1989_v30 = vld [vmem:[#allocation18 + $0x10] sm:$0xff]  ;;  %v1992_v35 = vld [vmem:[#allocation18 + $0x28] sm:$0xff] }
 0x305   : > { %1428 = vst [vmem:[#allocation2 + $0x2] sm:$0xff] %v3790_v36  ;;  %v1991_v33 = vld [vmem:[#allocation18 + $0x20] sm:$0xff]  ;;  %v1993_v38 = vld [vmem:[#allocation18 + $0x30] sm:$0xff] }
 0x30b   : > { %v1432_v40 = vld [vmem:[#allocation2 + $0x10] sm:$0xf] }
 0x30c   : > { %v1430_v43 = vld [vmem:[#allocation2] sm:$0xff]  ;;  %v1431_v44 = vld [vmem:[#allocation2 + $0x8] sm:$0xff]  ;;  %1704 = vst [vmem:[#allocation2 + $0x10] sm:$0xf] %v3281_v5 }
 0x30d   : > { %1546 = vmatmul.mubr.f32.vlgmr.msra.gmra.mrb[12].mxu1 %v1430_v43  ;;  %1702 = vst [vmem:[#allocation2] sm:$0xff] %v3281_v5  ;;  %2509 = vmatmul.mubr.f32.vlgmr.msra.gmra.mrb[14].mxu0 %v1430_v43  ;;  %1703 = vst [vmem:[#allocation2 + $0x8] sm:$0xff] %v3281_v5  ;;  %v1755_v43 = vld [vmem:[#allocation16 + $0x168] sm:$0xff] }
 0x30e   : > { %1551 = vmatprep.mubr.f32.mxu1 %v3281_v5  ;;  %2511 = vmatprep.mubr.msk.f32.mxu0 %vm3280_vm0, %v3281_v5 }
 0x30f   : > { %2796 = vmatpush1.bf16.msra.mxu1 %v2795_v41  ;;  %2827 = vmatpush3.bf16.msra.mxu0 %v2826_v42  ;;  %v1752_v42 = vld [vmem:[#allocation16 + $0x150] sm:$0xff] }
 0x310   : > { %2828 = vmatprep.subr.bf16.mxu0 %v3279_v4  ;;  %2798 = vmatprep.subr.bf16.mxu1 %v2797_v47  ;;  %v2823_v45 = vpack.c.bf16 %v1755_v43, %v1752_v42  ;;  %v1997_v42 = vld [vmem:[#allocation18 + $0x50] sm:$0xff]  ;;  %v1998_v43 = vld [vmem:[#allocation18 + $0x58] sm:$0xff] }
 0x311   : > { %1552 = vmatmul.mubr.f32.gmra.mrb[14].mxu1 %v1431_v44  ;;  %2512 = vmatmul.mubr.f32.gmra.mrb[16].mxu0 %v1431_v44  ;;  %v1754_v44 = vld [vmem:[#allocation16 + $0x160] sm:$0xff] }
 0x312   : > { %1557 = vmatprep.mubr.f32.mxu1 %v3281_v5  ;;  %2514 = vmatprep.mubr.msk.f32.mxu0 %vm3280_vm0, %v3281_v5  ;;  %v2847_v47 = vpack.c.bf16 %v1757_v46, %v1754_v44  ;;  %v2865_v44 = vpack.c.bf16 %v1998_v43, %v1997_v42  ;;  %v2000_v46 = vld [vmem:[#allocation18 + $0x68] sm:$0xff] }
 0x313   : > { %2800 = vmatpush1.bf16.msra.mxu1 %v2799_v51  ;;  %2830 = vmatpush3.bf16.msra.mxu0 %v2829_v52 }
 0x314   : > { %2831 = vmatprep.subr.bf16.mxu0 %v3279_v4  ;;  %2802 = vmatprep.subr.bf16.mxu1 %v2801_v57 }
 0x315   : > { %1558 = vmatmul.mubr.f32.gmra.mrb[16].mxu1 %v1432_v40  ;;  %2515 = vmatmul.mubr.f32.gmra.mrb[18].mxu0 %v1432_v40  ;;  %v1756_v40 = vld [vmem:[#allocation16 + $0x170] sm:$0xff] }
 0x316   : > { %1822 = vmatprep.mubr.f32.mxu1 %v3281_v5  ;;  %2549 = vmatprep.mubr.msk.f32.mxu0 %vm3280_vm0, %v3281_v5  ;;  %v2821_v41 = vpack.c.bf16 %v1756_v40, %v1753_v55  ;;  %v1995_v55 = vld [vmem:[#allocation18 + $0x40] sm:$0xff]  ;;  %v1996_v40 = vld [vmem:[#allocation18 + $0x48] sm:$0xff] }
 0x317   : > { %2804 = vmatpush1.bf16.msra.mxu1 %v2803_v61  ;;  %2833 = vmatpush3.bf16.msra.mxu0 %v2832_v63 }
 0x318   : > { %2834 = vmatprep.subr.bf16.mxu0 %v3279_v4  ;;  %2806 = vmatprep.subr.bf16.mxu1 %v2805_v2 }
 0x31b   : > { %2808 = vmatpush1.bf16.msra.mxu1 %v2807_v8  ;;  %2836 = vmatpush3.bf16.msra.mxu0 %v2835_v10  ;;  %v2238_v8 = vld [vmem:[%s3914_s12] ss:$0 sm:$0xff] }
 0x31c   : > { %2837 = vmatprep.subr.bf16.mxu0 %v3279_v4  ;;  %2810 = vmatprep.subr.bf16.mxu1 %v2809_v13 }
 0x31f   : > { %2812 = vmatpush1.bf16.msra.mxu1 %v2811_v17  ;;  %2839 = vmatpush3.bf16.msra.mxu0 %v2838_v19  ;;  %v1696_v17 = vpop.permute.xlu1 %1695 }
 0x320   : > { %2840 = vmatprep.subr.bf16.mxu0 %v3279_v4  ;;  %2814 = vmatprep.subr.bf16.mxu1 %v2813_v22 }
 0x323   : > { %2816 = vmatpush1.bf16.msra.mxu1 %v2815_v25  ;;  %2842 = vmatpush3.bf16.msra.mxu0 %v2841_v28  ;;  %v1988_v28 = vld [vmem:[#allocation18 + $0x8] sm:$0xff] }
 0x324   : > { %2843 = vmatprep.subr.bf16.mxu0 %v3279_v4  ;;  %2818 = vmatprep.subr.bf16.mxu1 %v2817_v31  ;;  %v2850_v29 = vpack.c.bf16 %v1988_v28, %v1987_v27  ;;  %v1990_v31 = vld [vmem:[#allocation18 + $0x18] sm:$0xff] }
 0x325   : > { %v2853_v32 = vpack.c.bf16 %v1990_v31, %v1989_v30 }
 0x327   : > { %2820 = vmatpush1.bf16.msra.mxu1 %v2819_v37  ;;  %2845 = vmatpush3.bf16.msra.mxu0 %v2844_v39  ;;  %v2856_v37 = vpack.c.bf16 %v1992_v35, %v1991_v33 }
 0x328   : > { %2846 = vmatprep.subr.bf16.mxu0 %v3279_v4  ;;  %2822 = vmatprep.subr.bf16.mxu1 %v2821_v41  ;;  %v2862_v41 = vpack.c.bf16 %v1996_v40, %v1995_v55 }
 0x32b   : > { %2824 = vmatpush1.bf16.msra.mxu1 %v2823_v45  ;;  %2848 = vmatpush3.bf16.msra.mxu0 %v2847_v47  ;;  %v1999_v45 = vld [vmem:[#allocation18 + $0x60] sm:$0xff] }
 0x32c   : > { %2849 = vmatprep.subr.bf16.mxu1 %v3279_v4  ;;  %v2868_v47 = vpack.c.bf16 %v2000_v46, %v1999_v45 }
 0x3e0   : > { %v1547_v48 = vpop.f32.mrb[12].mxu1  ;;  %v1629_v49 = vpop.f32.mrb[14].mxu0 }
 0x3e1   : > { %v1549_v50 = vpop.f32.mrb[13].mxu1  ;;  %v2510_v51 = vpop.f32.mrb[15].mxu0  ;;  %v1659_v53 = vrot.slane %v1629_v49, 4  ;;  %v2002_v49 = vld [vmem:[#allocation18 + $0x78] sm:$0xff] }
 0x3e2   : > { %v1646_v59 = vrot.slane %v1549_v50, 2 }
 0x3e4   : > { %v1553_v56 = vpop.f32.mrb[14].mxu1  ;;  %v1634_v52 = vpop.f32.mrb[16].mxu0 }
 0x3e5   : > { %v1660_v54 = vrot.slane %v1634_v52, 4  ;;  %v1555_v57 = vpop.f32.mrb[15].mxu1  ;;  %v2513_v58 = vpop.f32.mrb[17].mxu0 }
 0x3e6   : > { %v1647_v60 = vrot.slane %v1555_v57, 2 }
 0x3e7   : > { %v1661_v61 = vsel %vm1658_vm7, %v1659_v53, %v1660_v54 }
 0x3e8   : > { %v1648_v62 = vsel %vm1005_vm1, %v1646_v59, %v1647_v60  ;;  %v1559_v63 = vpop.f32.mrb[16].mxu1  ;;  %v1639_v0 = vpop.f32.mrb[18].mxu0 }
 0x3e9   : > { %v1653_v1 = vadd.f32 %v1648_v62, %v1547_v48  ;;  %v1662_v2 = vrot.slane %v1639_v0, 4  ;;  %v1560_v3 = vpop.f32.mrb[17].mxu1  ;;  %v2516_v6 = vpop.f32.mrb[19].mxu0  ;;  %v2001_v48 = vld [vmem:[#allocation18 + $0x70] sm:$0xff] }
 0x3ea   : > { %v1649_v7 = vrot.slane %v1560_v3, 2  ;;  %v2871_v50 = vpack.c.bf16 %v2002_v49, %v2001_v48 }
 0x3eb   : > { %v1666_v9 = vadd.f32 %v1661_v61, %v1653_v1  ;;  %v1663_v10 = vsel %vm1658_vm7, %v1660_v54, %v1662_v2 }
 0x3ec   : > { %v1650_v11 = vsel %vm1005_vm1, %v1647_v60, %v1649_v7 }
 0x3ed   : > { %v1654_v13 = vadd.f32 %v1650_v11, %v1553_v56  ;;  %v1675_v14 = vmul.f32 %v2238_v8, %v1666_v9  ;;  %v2241_v9 = vld [vmem:[%s3982_s29] ss:$0 sm:$0xff]  ;;  %s2076_s29 = scalar_lea.sflag [#allocation9], %s3678_s21 }
 0x3ef   : > { %v1667_v15 = vadd.f32 %v1663_v10, %v1654_v13  ;;  %v1684_v16 = vadd.f32 %v2239_v12, %v1675_v14  ;;  %v2242_v13 = vld [vmem:[%s3983_s3] ss:$0 sm:$0xff]  ;;  %s3194_s3 = scalar_lea.vmem %s3193_s9, 32 }
 0x3f0   : > { %p3196_p12 = scmp.lt.s32.totalorder %s3194_s3, %s3188_s27 }
 0x3f1   : > { %v1676_v18 = vmul.f32 %v2238_v8, %v1667_v15  ;;  %vm1686_vm8 = vcmp.ge.f32.partialorder %v1684_v16, 0.0  ;;  %v1698_v19 = vmul.f32 %v1696_v17, %v1684_v16 }
 0x3f2   : > { %p3197_p13 = por %p3196_p12, %p3195_p11 }
 0x3f3   : > { %v1685_v20 = vadd.f32 %v2239_v12, %v1676_v18  ;;  %v1700_v21 = vsel %vm1686_vm8, %v1684_v16, %v1698_v19  ;;  %v1972_v19 = vpop.permute.xlu1 %1971 }
 0x3f4   : > { %1705 = vst [vmem:[#allocation2 + $0x2] sm:$0xff] %v1700_v21  ;;  %p3198_p8 = pnand %p3197_p13, %p3191_p1 }
 0x3f5   : > { %vm1687_vm9 = vcmp.ge.f32.partialorder %v1685_v20, 0.0  ;;  %v1699_v22 = vmul.f32 %v1696_v17, %v1685_v20 }
 0x3f7   : > { %v1701_v23 = vsel %vm1687_vm9, %v1685_v20, %v1699_v22 }
 0x3f8   : > { %1706 = vst [vmem:[#allocation2 + $0xa] sm:$0xff] %v1701_v23 }
 0x3fb   : > { %v1707_v24 = vld [vmem:[#allocation2] sm:$0xff] }
 0x3fc   : > { %1823 = vmatmul.mubr.f32.vlgmr.msra.gmra.mrb[18].mxu1 %v1707_v24  ;;  %2550 = vmatmul.mubr.f32.vlgmr.msra.gmra.mrb[20].mxu0 %v1707_v24 }
 0x3fd   : > { %1828 = vmatprep.mubr.f32.mxu1 %v3281_v5  ;;  %2552 = vmatprep.mubr.msk.f32.mxu0 %vm3280_vm0, %v3281_v5 }
 0x3fe   : > { %2851 = vmatpush3.bf16.msra.mxu1 %v2850_v29 }
 0x3ff   : > { %v1708_v25 = vld [vmem:[#allocation2 + $0x8] sm:$0xff]  ;;  %v1709_v26 = vld [vmem:[#allocation2 + $0x10] sm:$0xf]  ;;  %2852 = vmatprep.subr.bf16.mxu1 %v3279_v4 }
 0x400   : > { %1829 = vmatmul.mubr.f32.gmra.mrb[20].mxu1 %v1708_v25  ;;  %2553 = vmatmul.mubr.f32.gmra.mrb[22].mxu0 %v1708_v25 }
 0x401   : > { %1834 = vmatprep.mubr.f32.mxu1 %v3281_v5  ;;  %2555 = vmatprep.mubr.msk.f32.mxu0 %vm3280_vm0, %v3281_v5 }
 0x402   : > { %2854 = vmatpush3.bf16.msra.mxu1 %v2853_v32 }
 0x403   : > { %2855 = vmatprep.subr.bf16.mxu1 %v3279_v4 }
 0x404   : > { %1835 = vmatmul.mubr.f32.gmra.mrb[22].mxu1 %v1709_v26  ;;  %2556 = vmatmul.mubr.f32.gmra.mrb[24].mxu0 %v1709_v26 }
 0x405   : > { %2590 = vmatprep.mubr.msk.f32.mxu1 %vm3280_vm0, %v3281_v5  ;;  %v1994_v5 = vld [vmem:[#allocation18 + $0x38] sm:$0xff] }
 0x406   : > { %2857 = vmatpush3.bf16.msra.mxu1 %v2856_v37  ;;  %v2859_v39 = vpack.c.bf16 %v1994_v5, %v1993_v38  ;;  %v2003_v37 = vld [vmem:[%s3984_s13] sm:$0x1] }
 0x407   : > { %2858 = vmatprep.subr.bf16.mxu1 %v3279_v4 }
 0x40a   : > { %2860 = vmatpush3.bf16.msra.mxu1 %v2859_v39 }
 0x40b   : > { %2861 = vmatprep.subr.bf16.mxu1 %v3279_v4 }
 0x40e   : > { %2863 = vmatpush3.bf16.msra.mxu1 %v2862_v41 }
 0x40f   : > { %2864 = vmatprep.subr.bf16.mxu1 %v3279_v4 }
 0x412   : > { %2866 = vmatpush3.bf16.msra.mxu1 %v2865_v44 }
 0x413   : > { %2867 = vmatprep.subr.bf16.mxu1 %v3279_v4 }
 0x416   : > { %2869 = vmatpush3.bf16.msra.mxu1 %v2868_v47 }
 0x417   : > { %2870 = vmatprep.subr.bf16.mxu1 %v3279_v4 }
 0x41a   : > { %2872 = vmatpush3.bf16.msra.mxu1 %v2871_v50 }
 0x4cf   : > { %v1824_v51 = vpop.f32.mrb[18].mxu1  ;;  %v1906_v56 = vpop.f32.mrb[20].mxu0 }
 0x4d0   : > { %v1826_v52 = vpop.f32.mrb[19].mxu1  ;;  %v2551_v53 = vpop.f32.mrb[21].mxu0  ;;  %v1935_v58 = vrot.slane %v1906_v56, 4 }
 0x4d1   : > { %v1923_v62 = vrot.slane %v1826_v52, 2 }
 0x4d3   : > { %v1830_v54 = vpop.f32.mrb[20].mxu1  ;;  %v1911_v57 = vpop.f32.mrb[22].mxu0 }
 0x4d4   : > { %v1936_v59 = vrot.slane %v1911_v57, 4  ;;  %v1832_v60 = vpop.f32.mrb[21].mxu1  ;;  %v2554_v61 = vpop.f32.mrb[23].mxu0 }
 0x4d5   : > { %v1924_v63 = vrot.slane %v1832_v60, 2 }
 0x4d6   : > { %v1937_v0 = vsel %vm1658_vm7, %v1935_v58, %v1936_v59 }
 0x4d7   : > { %v1925_v1 = vsel %vm1005_vm1, %v1923_v62, %v1924_v63  ;;  %v1836_v2 = vpop.f32.mrb[22].mxu1  ;;  %v1916_v3 = vpop.f32.mrb[24].mxu0 }
 0x4d8   : > { %v1930_v4 = vadd.f32 %v1925_v1, %v1824_v51  ;;  %v1938_v6 = vrot.slane %v1916_v3, 4  ;;  %v1837_v7 = vpop.f32.mrb[23].mxu1  ;;  %v2557_v8 = vpop.f32.mrb[25].mxu0 }
 0x4d9   : > { %v1926_v10 = vrot.slane %v1837_v7, 2 }
 0x4da   : > { %v1942_v11 = vadd.f32 %v1937_v0, %v1930_v4  ;;  %v1939_v12 = vsel %vm1658_vm7, %v1936_v59, %v1938_v6 }
 0x4db   : > { %v1927_v14 = vsel %vm1005_vm1, %v1924_v63, %v1926_v10 }
 0x4dc   : > { %v1951_v15 = vmul.f32 %v2241_v9, %v1942_v11  ;;  %v1931_v16 = vadd.f32 %v1927_v14, %v1830_v54 }
 0x4de   : > { %v1960_v17 = vadd.f32 %v2242_v13, %v1951_v15  ;;  %v1943_v18 = vadd.f32 %v1939_v12, %v1931_v16 }
 0x4e0   : > { %v1974_v20 = vmul.f32 %v1972_v19, %v1960_v17  ;;  %v1952_v21 = vmul.f32 %v2241_v9, %v1943_v18  ;;  %vm1962_vm10 = vcmp.ge.f32.partialorder %v1960_v17, 0.0 }
 0x4e2   : > { %v1961_v22 = vadd.f32 %v2242_v13, %v1952_v21  ;;  %v1976_v23 = vsel %vm1962_vm10, %v1960_v17, %v1974_v20 }
 0x4e3   : > { %v1978_v26 = vadd.f32 %v1976_v23, %v3790_v36 }
 0x4e4   : > { %vm1963_vm11 = vcmp.ge.f32.partialorder %v1961_v22, 0.0  ;;  %v1975_v24 = vmul.f32 %v1972_v19, %v1961_v22 }
 0x4e6   : > { %v1977_v25 = vsel %vm1963_vm11, %v1961_v22, %v1975_v24 }
 0x4e7   : > { %v1979_v27 = vadd.f32 %v1977_v25, %v3788_v34 }
 0x4e9   : > { %v1980_v28 = vmax.f32 %v1978_v26, %v1979_v27 }
 0x4eb   : > { %v1981_v29 = vrot.slane %v1980_v28, 4 }
 0x4ed   : > { %v1982_v30 = vmax.f32 %v1980_v28, %v1981_v29 }
 0x4ef   : > { %v1983_v31 = vrot.slane %v1982_v30, 2 }
 0x4f1   : > { %v1984_v32 = vmax.f32 %v1982_v30, %v1983_v31 }
 0x4f3   : > { %v1985_v33 = vrot.slane %v1984_v32, 1 }
 0x4f5   : > { %v1986_v35 = vmax.f32 %v1984_v32, %v1985_v33 }
 0x4f7   : > { %2591 = vmatmul.mubr.f32.vlgmr.msra.gmra.mrb[24].mxu1 %v1986_v35 }
 0x5ca   : > { %v2070_v36 = vpop.f32.mrb[24].mxu1 }
 0x5cb   : > { %v2071_v38 = vadd.f32 %v2070_v36, %v2003_v37  ;;  %v2592_v34 = vpop.f32.mrb[25].mxu1 }
 0x5cd   : > { %2074 = vst [vmem:[%s768_s20] sm:$0x1] %v2071_v38 }
 0x5ce   : > { %3201 = shalt.err (!%p3198_p8)
}
 0x5cf   : > { %s3202_s21 = scalar_lea.hbm %s3859_s26, 16  ;;  %s3206_s13 = scalar_lea.hbm %s3985_s2, 32 }
 0x5d0   : > { %p3203_p7 = scmp.ne.s32.totalorder %s3859_s26, %s3202_s21  ;;  %p3207_p3 = scmp.lt.u32.totalorder %s3859_s26, %s3985_s2 }
 0x5d1   : > { %p3208_p0 = scmp.lt.u32.totalorder %s3206_s13, %s3202_s21  ;;  %p3210_p6 = scmp.lt.u32.totalorder %s3202_s21, %s3859_s26 }
 0x5d2   : > { %p3204_p9 = pnand %p3203_p7, %p3986_p5 }
 0x5d3   : > { %p3209_p2 = por %p3208_p0, %p3207_p3 }
 0x5d4   : > { %p3205_p4 = pneg %p3204_p9 }
 0x5d5   : > { %p3211_p10 = por %p3210_p6, %p3209_p2 }
 0x5d7   : > { %p3212_p1 = pnand %p3211_p10, %p3205_p4 }
 0x5d9   : > { %3215 = shalt.err (!%p3212_p1)
}
 0x5da   : > { %2899 = dma.vmem_to_hbm [thread:$0]  (%p3986_p5), %s3861_s11, 16, %s3859_s26, %s2076_s29  }
 0x5db PF: > { %s2100_s15 = sand.u32 1, %s3254_s8   ;;  %p3987_p11 = scmp.ne.s32.totalorder %s3969_s18, 0 }
 0x5dc   : > { %p3988_p12 = scmp.ge.s32.totalorder %s3266_s5, 2  ;;  %s2101_s1 = scalar_lea.sflag [#allocation9], %s2100_s15 }
 0x5de   : > { %p2925_p13 = pnand %p3988_p12, %p3987_p11 }
 0x5e0   : > { %3249 = dma.done.wait (!%p2925_p13), %s2101_s1, 16  }
 0x5e1   : > { %3251 = vsyncadd (!%p2925_p13), %s2101_s1, 4294967280  ;;  %p45_p8 = scmp.ge.s32.totalorder %s3596_s24, 4   ;;  %s3989_s8 = smov %s3258_s30 }
 0x5e2   : > { %s3990_s30 = smov %s3262_s14  ;;  %s3991_s14 = smov %s3607_s17 }
 0x5e3   : > { %s3992_s5 = smov %s3596_s24  ;;  %47 = sbr.rel (!%p45_p8) target bundleno = 23 (0x17), region = 173 }
 0x5ea   :  { %2105 = vsyncpa [#allocation8], 1 }
 0x5eb   :  { %2107 = vsyncpa [#allocation8 + $0x1], 1 }
 0x5ec   :  { %2108 = vsyncpa [#allocation11], 1 }
 0x5ed   :  { %2109 = vsyncpa [#allocation14], 1 }
 0x5ee   :  { %2110 = vsyncpa [#allocation17], 1 }
 0x5ef   :  { %2111 = vsyncpa [#allocation9], 1 }
 0x5f0   :  { %2113 = vsyncpa [#allocation9 + $0x1], 1 }

</bundles_post_ra>
